<compile_context>
chip_gen: v5e
topology: v5e:2x2
jax: 0.10.0
libtpu: 0.0.40
codegen_flags: <defaults>
</compile_context>

<pallas_src>
import jax
import jax.numpy as jnp
from jax.experimental import pallas as pl
from jax.experimental.pallas import tpu as pltpu

# ---- deterministic small config (stand-in for cfg / ctor args) -------------
BATCH = 8
C_IN = 16
H = W = 16
EMB = 64
QUEUE = 16384          # stand-in for 65536; QUEUE % BATCH == 0 holds
SAMPLE_NUM = 3         # 1 query view + 2 key views
MOMENTUM = 0.999
COSFACE_S = 64.0       # deterministic margin_loss stand-in: CosFace(s, m)
COSFACE_M = 0.4


def _detect_ncores():
    # 2 TensorCores per chip only on v7x; v5e / v6e have a single TC, where a
    # size-2 leading axis would just be a serial loop + extra merge work.
    try:
        kind = jax.devices()[0].device_kind.lower()
    except Exception:
        return 1
    return 2 if ("v7" in kind or "7x" in kind) else 1


NCORES = _detect_ncores()

# Queue DMA tile (lanes).  Big tiles amortize the ~0.35 us per-grid-step cost;
# at TK=8192 a bf16 [64, 8192] tile is 1 MiB, so the double-buffered footprint
# (~2.1 MiB + labels) fits easily inside even v7x's 32 MiB scoped default of
# its 64 MiB VMEM (no vmem_limit_bytes override needed; set it if TK > 16384).
TK_MAX = 8192
TK = min(TK_MAX, QUEUE // NCORES)
# In-kernel compute sub-chunk: keeps the f32 [B, TSUB] intermediates at ~16
# vregs so the big DMA tile doesn't turn into register spills.
TSUB = min(2048, TK)
assert QUEUE % (NCORES * TK) == 0
assert TK % TSUB == 0 and TK % 128 == 0 and QUEUE % BATCH == 0


def _l2_normalize(x, axis, eps=1e-12):
    n = jnp.sqrt(jnp.sum(x * x, axis=axis, keepdims=True))
    return x / jnp.maximum(n, eps)


# ---------------------------------------------------------------------------
# Fused backbone kernel.  The stand-in backbone is global-average-pool +
# linear projection; the pool is folded into the matmul by pre-expanding the
# weight to [C*HW, E] scaled by 1/HW, so the kernel is one MXU op:
#   x: [S*B, C*HW]   w_stack: [2, C*HW, E]   b_stack: [2, 1, E]  ->  [S*B, E]
# One pallas_call covers the query view AND all key views; the per-view
# parameter set (q-encoder vs momentum k-encoder) is chosen by a scalar-
# prefetched index feeding the weight/bias index_maps.
# ---------------------------------------------------------------------------
def backbone_fused_kernel(pidx_ref, x_ref, w_ref, b_ref, o_ref):
    del pidx_ref                                            # used in index_maps
    o_ref[...] = (jnp.dot(x_ref[...], w_ref[0],
                          preferred_element_type=jnp.float32)
                  + b_ref[0])


def _fold_pool_into_weight(w):
    # [C, E] -> [C*HW, E]; mean over spatial folded into the projection.
    return jnp.repeat(w, H * W, axis=0) / float(H * W)


def backbone_fused(params_q, params_k, imgs):
    n = imgs.shape[0]
    assert n == SAMPLE_NUM * BATCH
    x = imgs.reshape(n, C_IN * H * W).astype(jnp.float32)
    w_stack = jnp.stack([_fold_pool_into_weight(params_q["w"]),
                         _fold_pool_into_weight(params_k["w"])], axis=0)
    b_stack = jnp.stack([params_q["b"], params_k["b"]], axis=0)  # [2, 1, E]
    pidx = jnp.array([0] + [1] * (SAMPLE_NUM - 1), dtype=jnp.int32)
    return pl.pallas_call(
        backbone_fused_kernel,
        out_shape=jax.ShapeDtypeStruct((n, EMB), jnp.float32),
        grid_spec=pltpu.PrefetchScalarGridSpec(
            num_scalar_prefetch=1,
            grid=(SAMPLE_NUM,),
            in_specs=[
                pl.BlockSpec((BATCH, C_IN * H * W), lambda i, p: (i, 0)),
                pl.BlockSpec((1, C_IN * H * W, EMB), lambda i, p: (p[i], 0, 0)),
                pl.BlockSpec((1, 1, EMB), lambda i, p: (p[i], 0, 0)),
            ],
            out_specs=pl.BlockSpec((BATCH, EMB), lambda i, p: (i, 0)),
        ),
        compiler_params=pltpu.CompilerParams(
            dimension_semantics=("parallel",)),   # views independent
    )(pidx, x, w_stack, b_stack)


# ---------------------------------------------------------------------------
# DCC contrastive hot path: per-core sum of exp over the negatives
#   l_neg = q @ weight_queue (bf16 stream, f32 accumulation on the MXU)
#   same-label columns -> -s (reference: -1e9 mask, then clamp(-1,1), then *s)
#   logits are bounded by +/- s, so a FIXED reference max m = s is used;
#   only sum(exp(logit - s)) is accumulated (no cross-lane max, no rescale).
# Grid: (NCORES parallel, QUEUE/(NCORES*TK) arbitrary).  Each core owns a
# contiguous slice of the queue and emits its partial sum.
# ---------------------------------------------------------------------------
def dcc_neg_kernel(q_ref, lab_ref, wq_ref, lq_ref, s_out, s_sc):
    j = pl.program_id(1)

    @pl.when(j == 0)
    def _():
        s_sc[...] = jnp.zeros_like(s_sc)

    def body(t, acc):
        start = pl.multiple_of(t * TSUB, TSUB)
        wq = wq_ref[:, pl.ds(start, TSUB)]                    # [E, TSUB] bf16
        lq = lq_ref[:, pl.ds(start, TSUB)]                    # [1, TSUB] f32
        l_neg = jnp.dot(q_ref[...], wq,
                        preferred_element_type=jnp.float32)   # [B, TSUB] f32
        # reference mask-then-clamp collapses to: masked -> -s, else clip*s
        logits = jnp.where(lab_ref[...] == lq,
                           -COSFACE_S,
                           jnp.clip(l_neg, -1.0, 1.0) * COSFACE_S)
        # fixed reference max m = s: exp(logit - s) <= 1 by construction
        return acc + jnp.sum(jnp.exp(logits - COSFACE_S), axis=1, keepdims=True)

    s_sc[...] = jax.lax.fori_loop(0, TK // TSUB, body, s_sc[...], unroll=True)

    @pl.when(j == pl.num_programs(1) - 1)
    def _():
        s_out[0] = s_sc[...]


def dcc_loss(norm_emb, norm_weight, labels_f, weight_queue_bf16, label_queue):
    b, e = norm_emb.shape
    kq = weight_queue_bf16.shape[1]
    assert kq % (NCORES * TK) == 0
    steps_per_core = kq // (NCORES * TK)

    q_bf16 = norm_emb.astype(jnp.bfloat16)

    s_part = pl.pallas_call(
        dcc_neg_kernel,
        out_shape=jax.ShapeDtypeStruct((NCORES, b, 1), jnp.float32),
        grid_spec=pltpu.PrefetchScalarGridSpec(
            num_scalar_prefetch=0,
            grid=(NCORES, steps_per_core),
            in_specs=[
                pl.BlockSpec((b, e), lambda c, j: (0, 0)),     # q (bf16)
                pl.BlockSpec((b, 1), lambda c, j: (0, 0)),     # labels
                pl.BlockSpec((e, TK),                          # queue tile
                             lambda c, j: (0, c * steps_per_core + j)),
                pl.BlockSpec((1, TK),                          # label_queue
                             lambda c, j: (0, c * steps_per_core + j)),
            ],
            out_specs=pl.BlockSpec((1, b, 1), lambda c, j: (c, 0, 0)),
            scratch_shapes=[pltpu.VMEM((b, 1), jnp.float32)],
        ),
        compiler_params=pltpu.CompilerParams(
            dimension_semantics=("parallel", "arbitrary")),
    )(q_bf16, labels_f, weight_queue_bf16, label_queue)

    # Positive logit with CosFace margin on target class 0 (tiny, plain JAX).
    l_pos = jnp.sum(norm_emb * norm_weight, axis=1, keepdims=True)   # [B, 1]
    pos_logit = (jnp.clip(l_pos, -1.0, 1.0) - COSFACE_M) * COSFACE_S

    # Merge per-core partial sums with the positive logit under the same
    # fixed reference max m = s (pos_logit <= (1-m)*s < s, so no overflow).
    s_all = jnp.sum(s_part, axis=0) + jnp.exp(pos_logit - COSFACE_S)  # [B, 1]
    per_row = COSFACE_S + jnp.log(s_all) - pos_logit  # CE with target class 0
    return jnp.mean(per_row)                          # torch CE default: mean


# ---------------------------------------------------------------------------
# get_weight attention / momentum update / queue update — plain JAX glue.
# ---------------------------------------------------------------------------
def dequeue_enqueue(weight_queue, label_queue, ptr, keys, labels_f):
    # relies on QUEUE % BATCH == 0 (dynamic_update_slice clamps, not wraps)
    wq = jax.lax.dynamic_update_slice(
        weight_queue, keys.T.astype(weight_queue.dtype), (0, ptr))
    lq = jax.lax.dynamic_update_slice(label_queue, labels_f.T, (0, ptr))
    return wq, lq, (ptr + keys.shape[0]) % QUEUE


def dcc_forward(params_q, params_k, state, img_q, img_k_list, labels):
    # momentum update of the key encoder (state update, no grad semantics);
    # does not affect the params_q path, so it can precede the fused backbone.
    params_k = jax.tree_util.tree_map(
        lambda q, k: k * MOMENTUM + q * (1.0 - MOMENTUM), params_q, params_k)

    # single fused backbone launch: query view + all key views
    imgs = jnp.concatenate([img_q] + list(img_k_list), axis=0)
    emb_all = backbone_fused(params_q, params_k, imgs)          # [S*B, E]

    local_emb = emb_all[:BATCH]
    norm_emb = _l2_normalize(local_emb, axis=1)

    # DCC attention over key views (cosine similarities -> softmax weights)
    weights = jnp.split(emb_all[BATCH:], SAMPLE_NUM - 1, axis=0)
    cos_sims = []
    for weight in weights:
        nw = _l2_normalize(weight, axis=1)
        cos_sims.append(jnp.sum(norm_emb * nw, axis=1))
    cos_sims = jnp.stack(cos_sims, axis=0)                      # [S-1, B]
    attention = jax.nn.softmax(cos_sims.T, axis=1)              # [B, S-1]
    local_weight = 0.0
    for i, weight in enumerate(weights):
        local_weight = local_weight + attention[:, i].reshape(BATCH, 1) * weight
    norm_weight = _l2_normalize(local_weight, axis=1)

    labels_f = labels.reshape(BATCH, 1).astype(jnp.float32)
    loss = dcc_loss(norm_emb, norm_weight, labels_f,
                    state["weight_queue"], state["label_queue"])

    wq, lq, ptr = dequeue_enqueue(state["weight_queue"], state["label_queue"],
                                  state["ptr"], norm_weight, labels_f)
    new_state = {"weight_queue": wq, "label_queue": lq, "ptr": ptr}
    return loss, params_k, new_state


if __name__ == "__main__":
    key = jax.random.PRNGKey(0)
    k1, k2, k3, k4, k5, k6, k7 = jax.random.split(key, 7)

    # deterministic parameter init (shapes implied by the module)
    w0 = jax.random.normal(k1, (C_IN, EMB), jnp.float32) * 0.05
    b0 = jnp.zeros((1, EMB), jnp.float32)
    params_q = {"w": w0, "b": b0}
    params_k = {"w": w0, "b": b0}   # param_k copied from param_q in __init__

    # queue stored in bf16 (L2-normalized keys; bf16 precision is ample)
    weight_queue = _l2_normalize(
        jax.random.normal(k2, (EMB, QUEUE), jnp.float32), axis=0
    ).astype(jnp.bfloat16)
    label_queue = jax.random.normal(k3, (1, QUEUE), jnp.float32)
    state = {"weight_queue": weight_queue, "label_queue": label_queue,
             "ptr": jnp.zeros((), jnp.int32)}

    img_q = jax.random.normal(k4, (BATCH, C_IN, H, W), jnp.float32)
    img_k_list = [jax.random.normal(k5, (BATCH, C_IN, H, W), jnp.float32),
                  jax.random.normal(k6, (BATCH, C_IN, H, W), jnp.float32)]
    labels = jax.random.randint(k7, (BATCH,), 0, 100)

    loss, params_k, state = dcc_forward(params_q, params_k, state,
                                        img_q, img_k_list, labels)
    loss = jax.block_until_ready(loss)
    assert bool(jnp.isfinite(loss))
    print("KERNEL_OK")
</pallas_src>

<mosaic_0001>
module attributes {stable_mosaic.version = 11 : i64} {
  func.func @backbone_fused_kernel(%arg0: i32, %arg1: memref<3xi32, #tpu.memory_space<smem>>, %arg2: memref<8x4096xf32, #tpu.memory_space<vmem>>, %arg3: memref<1x4096x64xf32, #tpu.memory_space<vmem>>, %arg4: memref<1x1x64xf32, #tpu.memory_space<vmem>>, %arg5: memref<8x64xf32, #tpu.memory_space<vmem>>) attributes {dimension_semantics = [#tpu.dimension_semantics<parallel>], iteration_bounds = array<i64: 3>, scalar_prefetch = 1 : i64, scratch_operands = 0 : i64, tpu.core_type = #tpu.core_type<tc>, window_params = [{transform_indices = @transform_0, window_bounds = array<i64: 8, 4096>}, {transform_indices = @transform_1, window_bounds = array<i64: 1, 4096, 64>}, {transform_indices = @transform_2, window_bounds = array<i64: 1, 1, 64>}, {transform_indices = @transform_3, window_bounds = array<i64: 8, 64>}]} {
    %c0 = arith.constant 0 : index
    %c0_0 = arith.constant 0 : index
    %0 = vector.load %arg2[%c0, %c0_0] : memref<8x4096xf32, #tpu.memory_space<vmem>>, vector<8x4096xf32>
    %c0_1 = arith.constant 0 : index
    %c0_2 = arith.constant 0 : index
    %c0_3 = arith.constant 0 : index
    %1 = vector.load %arg3[%c0_1, %c0_2, %c0_3] : memref<1x4096x64xf32, #tpu.memory_space<vmem>>, vector<1x4096x64xf32>
    %2 = vector.shape_cast %1 : vector<1x4096x64xf32> to vector<4096x64xf32>
    %cst = arith.constant dense<0.000000e+00> : vector<8x64xf32>
    %3 = tpu.matmul %0, %2, %cst {dimension_numbers = #tpu.dot_dimension_numbers<[1], [0], [0], [1], [0, 0, 1, 1], [], []>} : vector<8x4096xf32>, vector<4096x64xf32>, vector<8x64xf32> -> vector<8x64xf32>
    %c0_4 = arith.constant 0 : index
    %c0_5 = arith.constant 0 : index
    %c0_6 = arith.constant 0 : index
    %4 = vector.load %arg4[%c0_4, %c0_5, %c0_6] : memref<1x1x64xf32, #tpu.memory_space<vmem>>, vector<1x1x64xf32>
    %5 = vector.shape_cast %4 : vector<1x1x64xf32> to vector<1x64xf32>
    %6 = vector.broadcast %5 : vector<1x64xf32> to vector<8x64xf32>
    %7 = arith.addf %3, %6 : vector<8x64xf32>
    %c0_7 = arith.constant 0 : index
    %c0_8 = arith.constant 0 : index
    %8 = vector.load %arg5[%c0_7, %c0_8] : memref<8x64xf32, #tpu.memory_space<vmem>>, vector<8x64xf32>
    tpu.vector_store %arg5[%c0_7, %c0_8], %7 {strides = array<i32>} : memref<8x64xf32, #tpu.memory_space<vmem>>, vector<8x64xf32>,
    return
  }
  func.func @transform_0(%arg0: i32, %arg1: memref<3xi32, #tpu.memory_space<smem>>) -> (i32, i32) {
    %c0_i32 = arith.constant 0 : i32
    %c0_i32_0 = arith.constant 0 : i32
    return %arg0, %c0_i32 : i32, i32
  }
  func.func @transform_1(%arg0: i32, %arg1: memref<3xi32, #tpu.memory_space<smem>>) -> (i32, i32, i32) {
    %0 = arith.index_cast %arg0 : i32 to index
    %1 = memref.load %arg1[%0] : memref<3xi32, #tpu.memory_space<smem>>
    %c0_i32 = arith.constant 0 : i32
    %c0_i32_0 = arith.constant 0 : i32
    %c0_i32_1 = arith.constant 0 : i32
    return %1, %c0_i32, %c0_i32_0 : i32, i32, i32
  }
  func.func @transform_2(%arg0: i32, %arg1: memref<3xi32, #tpu.memory_space<smem>>) -> (i32, i32, i32) {
    %0 = arith.index_cast %arg0 : i32 to index
    %1 = memref.load %arg1[%0] : memref<3xi32, #tpu.memory_space<smem>>
    %c0_i32 = arith.constant 0 : i32
    %c0_i32_0 = arith.constant 0 : i32
    %c0_i32_1 = arith.constant 0 : i32
    return %1, %c0_i32, %c0_i32_0 : i32, i32, i32
  }
  func.func @transform_3(%arg0: i32, %arg1: memref<3xi32, #tpu.memory_space<smem>>) -> (i32, i32) {
    %c0_i32 = arith.constant 0 : i32
    %c0_i32_0 = arith.constant 0 : i32
    return %arg0, %c0_i32 : i32, i32
  }
}

</mosaic_0001>

<bundles_post_ra>
// kernel: tpu_custom_call.1
= control target key start
LH: loop header
LB: loop body
LE: loop exit
PB: predicated region body
PF: predicated region fallthrough
CT: control target
= control target key end

     0   :  { %s1646_s18 = smov [#allocation3]   ;;  %s2333_s0 = inlined_call_operand.vmem [shape: s32[3], index: 0, kind: input, shape index: {}]   ;;  %s2334_s1 = inlined_call_operand.vmem [shape: f32[24,4096], index: 1, kind: input, shape index: {}]   ;;  %s2335_s2 = inlined_call_operand.vmem [shape: f32[2,4096,64], index: 2, kind: input, shape index: {}]   ;;  %s2336_s3 = inlined_call_operand.vmem [shape: f32[2,1,64], index: 3, kind: input, shape index: {}]   ;;  %s2337_s4 = inlined_call_operand.hbm [shape: f32[24,64], index: 4, kind: output, shape index: {}]  }
   0x1   :  { %s10_s17 = sshll.u32 %s2333_s0, 4  ;;  %s11_s17 = int_to_ptr.vmem [resolvable:$true] %s10_s17 }
   0x2   :  { %13 = dma.vmem_to_smem %s11_s17, 16, %s1646_s18, [#allocation2] }
   0x3   :  { %1624 = dma.done.wait [#allocation2], 16 }
   0x4   :  { %1625 = vsyncadd [#allocation2], 4294967280 }
   0x5   :  { %16 = sfence }
   0x6   :  { %17 = vsyncpa [#allocation5], 0 }
   0x7   :  { %19 = vsyncpa [#allocation5 + $0x1], 0  ;;  %s1675_s19 = smov 0   ;;  %s1677_s20 = smov 0  }
   0x8   :  { %s1679_s21 = smov 0   ;;  %s1681_s22 = smov 0  }
   0x9 LB: > { %s1696_s0 = sadd.s32 4294967295, %s1644_s22   ;;  %s1512_s23 = sadd.s32 4294967294, %s1644_s22   ;;  %s1644_s22 = sphi %s1681_s22, %s2343_s22   ;;  %s1640_s21 = sphi %s1679_s21, %s2342_s21   ;;  %s1636_s20 = sphi %s1677_s20, %s2341_s20   ;;  %s1632_s19 = sphi %s1675_s19, %s2340_s19  }
   0xa   : > { %s1700_s24 = sadd.s32 1, %s1644_s22   ;;  %s114_s25 = sadd.s32 1, %s1640_s21 }
   0xb   : > { %s111_s26 = ssub.s32 %s1644_s22, %s1700_s24  ;;  %p124_p0 = scmp.ne.s32.totalorder %s1640_s21, %s1636_s20 }
   0xc   : > { %p112_p1 = scmp.eq.s32.totalorder %s111_s26, 0  ;;  %p125_p2 = scmp.eq.s32.totalorder %s1696_s0, 2 }
   0xd   : > { %p130_p3 = scmp.ne.s32.totalorder %s1636_s20, %s1632_s19  ;;  %p131_p4 = scmp.eq.s32.totalorder %s1512_s23, 2 }
   0xe   : > { %s1711_s27 = scalar_select %p112_p1, %s1640_s21, %s114_s25  }
   0xf   : > { %p1713_p5 = por %p125_p2, %p124_p0  ;;  %p1717_p6 = por %p131_p4, %p130_p3 }
  0x10   : > { %p1515_p7 = scmp.ge.s32.totalorder %s1644_s22, 1  ;;  %p175_p8 = scmp.lt.s32.totalorder %s1644_s22, 4 }
  0x12   : > { %p176_p9 = pnand %p1515_p7, %p175_p8 }
  0x13   : > { %s214_s30 = sld [smem:[#allocation3 + %s1696_s0]] (!%p176_p9)  ;;  %p209_p11 = scmp.lt.s32.totalorder (!%p176_p9), %s1696_s0, 2 }
  0x14   : > { %179 = sbr.rel (%p176_p9) target bundleno = 440 (0x1b8), region = 32  ;;  %s1884_s14 = sld [smem:[#allocation3 + %s1696_s0]] (!%p176_p9) }
  0x15   : > { %s206_s25 = sand.u32 (!%p176_p9), 1, %s1636_s20   ;;  %s1600_s15 = scalar_lea.hbm (!%p176_p9), %s2337_s4, 24 }
  0x16   : > { %s1516_s26 = sshll.u32 (!%p176_p9), %s206_s25, 3 }
  0x19   : > { %p215_p10 = scmp.lt.s32.totalorder %s214_s30, 1  ;;  %vm1414_vm0 = vcmask 523264  }
  0x1a   : > { %s1841_s9 = scalar_select %p209_p11, %s1696_s0, 2 }
  0x1b   : > { %s2345_s30 = smov (!%p215_p10, %s214_s30), 1  ;;  %p222_p12 = scmp.lt.s32.totalorder %s1884_s14, 1 }
  0x1c   : > { %s1526_s5 = sshll.u32 %s2345_s30, 12  ;;  %s1525_s10 = sshll.u32 %s1841_s9, 8 }
  0x1d   : > { %s1727_s8 = scalar_lea.vmem %s2335_s2, %s1526_s5  ;;  %s1861_s13 = scalar_lea.vmem %s2334_s1, %s1525_s10 }
  0x1e   : > { %v273_v0 = vld [vmem:[%s1727_s8 + $0x78] sm:$0xff]  ;;  %v272_v2 = vld [vmem:[%s1727_s8 + $0x70] sm:$0xff]  ;;  %v271_v6 = vld [vmem:[%s1727_s8 + $0x68] sm:$0xff]  ;;  %s2347_s14 = smov (!%p222_p12, %s1884_s14), 1  ;;  %s1522_s30 = sshll.u32 %s1696_s0, 3 }
  0x1f   : > { %v305_v1 = vld [vmem:[%s1727_s8 + $0x178] sm:$0xff]  ;;  %774 = vmatpush.msra.mxu0 %v273_v0  ;;  %v304_v4 = vld [vmem:[%s1727_s8 + $0x170] sm:$0xff]  ;;  %v303_v8 = vld [vmem:[%s1727_s8 + $0x168] sm:$0xff]  ;;  %s224_s17 = scalar_lea.vmem %s2336_s3, %s2347_s14  ;;  %s1427_s7 = scalar_lea.hbm %s2337_s4, %s1522_s30 }
  0x20   : > { %814 = vmatpush.msra.mxu2 %v305_v1  ;;  %v289_v3 = vld [vmem:[%s1727_s8 + $0xf8] sm:$0xff]  ;;  %v288_v7 = vld [vmem:[%s1727_s8 + $0xf0] sm:$0xff]  ;;  %v287_v10 = vld [vmem:[%s1727_s8 + $0xe8] sm:$0xff]  ;;  %s1431_s10 = sshll.u32 %s1427_s7, 4  ;;  %s1417_s0 = scalar_lea.sflag [#allocation5], %s206_s25  ;;  %s1432_s10 = int_to_ptr.hbm [resolvable:$true] %s1431_s10 }
  0x21   : > { %v321_v5 = vld [vmem:[%s1727_s8 + $0x1f8] sm:$0xff]  ;;  %794 = vmatpush.msra.mxu1 %v289_v3  ;;  %775 = vmatpush.msra.mxu0 %v272_v2  ;;  %v320_v9 = vld [vmem:[%s1727_s8 + $0x1f0] sm:$0xff]  ;;  %v270_v11 = vld [vmem:[%s1727_s8 + $0x60] sm:$0xff]  ;;  %s1594_s11 = sshra.s32 %s1432_s10, 4  ;;  %s1595_s11 = int_to_ptr.hbm [resolvable:$true] %s1594_s11 }
  0x22   : > { %834 = vmatpush.msra.mxu3 %v321_v5  ;;  %815 = vmatpush.msra.mxu2 %v304_v4  ;;  %v302_v12 = vld [vmem:[%s1727_s8 + $0x160] sm:$0xff]  ;;  %v319_v13 = vld [vmem:[%s1727_s8 + $0x1e8] sm:$0xff]  ;;  %v269_v16 = vld [vmem:[%s1727_s8 + $0x58] sm:$0xff]  ;;  %s1596_s12 = scalar_lea.hbm %s1595_s11, 8  ;;  %p1601_p2 = scmp.lt.s32.totalorder %s1595_s11, %s2337_s4 }
  0x23   : > { %795 = vmatpush.msra.mxu1 %v288_v7  ;;  %776 = vmatpush.msra.mxu0 %v271_v6  ;;  %v286_v14 = vld [vmem:[%s1727_s8 + $0xe0] sm:$0xff]  ;;  %v301_v17 = vld [vmem:[%s1727_s8 + $0x158] sm:$0xff]  ;;  %v268_v20 = vld [vmem:[%s1727_s8 + $0x50] sm:$0xff]  ;;  %p1597_p13 = scmp.ne.s32.totalorder %s1595_s11, %s1596_s12  ;;  %p1602_p3 = scmp.lt.s32.totalorder %s1600_s15, %s1596_s12 }
  0x24   : > { %835 = vmatpush.msra.mxu3 %v320_v9  ;;  %816 = vmatpush.msra.mxu2 %v303_v8  ;;  %v318_v15 = vld [vmem:[%s1727_s8 + $0x1e0] sm:$0xff]  ;;  %v285_v18 = vld [vmem:[%s1727_s8 + $0xd8] sm:$0xff]  ;;  %v300_v21 = vld [vmem:[%s1727_s8 + $0x150] sm:$0xff] }
  0x25   : > { %796 = vmatpush.msra.mxu1 %v287_v10  ;;  %777 = vmatpush.msra.mxu0 %v270_v11  ;;  %v317_v19 = vld [vmem:[%s1727_s8 + $0x1d8] sm:$0xff]  ;;  %v284_v22 = vld [vmem:[%s1727_s8 + $0xd0] sm:$0xff]  ;;  %v267_v24 = vld [vmem:[%s1727_s8 + $0x48] sm:$0xff]  ;;  %p1598_p0 = pnand %p1597_p13, %p1713_p5  ;;  %p1603_p4 = por %p1602_p3, %p1601_p2 }
  0x26   : > { %836 = vmatpush.msra.mxu3 %v319_v13  ;;  %817 = vmatpush.msra.mxu2 %v302_v12  ;;  %v316_v23 = vld [vmem:[%s1727_s8 + $0x1d0] sm:$0xff]  ;;  %v299_v25 = vld [vmem:[%s1727_s8 + $0x148] sm:$0xff]  ;;  %v266_v28 = vld [vmem:[%s1727_s8 + $0x40] sm:$0xff] }
  0x27   : > { %797 = vmatpush.msra.mxu1 %v286_v14  ;;  %778 = vmatpush.msra.mxu0 %v269_v16  ;;  %v283_v26 = vld [vmem:[%s1727_s8 + $0xc8] sm:$0xff]  ;;  %v298_v29 = vld [vmem:[%s1727_s8 + $0x140] sm:$0xff]  ;;  %v265_v32 = vld [vmem:[%s1727_s8 + $0x38] sm:$0xff]  ;;  %p1599_p1 = pneg %p1598_p0 }
  0x28   : > { %837 = vmatpush.msra.mxu3 %v318_v15  ;;  %818 = vmatpush.msra.mxu2 %v301_v17  ;;  %v315_v27 = vld [vmem:[%s1727_s8 + $0x1c8] sm:$0xff]  ;;  %v282_v30 = vld [vmem:[%s1727_s8 + $0xc0] sm:$0xff]  ;;  %v297_v33 = vld [vmem:[%s1727_s8 + $0x138] sm:$0xff] }
  0x29   : > { %798 = vmatpush.msra.mxu1 %v285_v18  ;;  %779 = vmatpush.msra.mxu0 %v268_v20  ;;  %v314_v31 = vld [vmem:[%s1727_s8 + $0x1c0] sm:$0xff]  ;;  %v281_v34 = vld [vmem:[%s1727_s8 + $0xb8] sm:$0xff]  ;;  %v264_v36 = vld [vmem:[%s1727_s8 + $0x30] sm:$0xff]  ;;  %p1604_p7 = pnand %p1603_p4, %p1599_p1 }
  0x2a   : > { %838 = vmatpush.msra.mxu3 %v317_v19  ;;  %819 = vmatpush.msra.mxu2 %v300_v21  ;;  %v313_v35 = vld [vmem:[%s1727_s8 + $0x1b8] sm:$0xff]  ;;  %v296_v37 = vld [vmem:[%s1727_s8 + $0x130] sm:$0xff]  ;;  %v263_v40 = vld [vmem:[%s1727_s8 + $0x28] sm:$0xff] }
  0x2b   : > { %799 = vmatpush.msra.mxu1 %v284_v22  ;;  %780 = vmatpush.msra.mxu0 %v267_v24  ;;  %v280_v38 = vld [vmem:[%s1727_s8 + $0xb0] sm:$0xff]  ;;  %v295_v41 = vld [vmem:[%s1727_s8 + $0x128] sm:$0xff]  ;;  %v262_v44 = vld [vmem:[%s1727_s8 + $0x20] sm:$0xff] }
  0x2c   : > { %839 = vmatpush.msra.mxu3 %v316_v23  ;;  %820 = vmatpush.msra.mxu2 %v299_v25  ;;  %v312_v39 = vld [vmem:[%s1727_s8 + $0x1b0] sm:$0xff]  ;;  %v279_v42 = vld [vmem:[%s1727_s8 + $0xa8] sm:$0xff]  ;;  %v294_v45 = vld [vmem:[%s1727_s8 + $0x120] sm:$0xff] }
  0x2d   : > { %800 = vmatpush.msra.mxu1 %v283_v26  ;;  %781 = vmatpush.msra.mxu0 %v266_v28  ;;  %v311_v43 = vld [vmem:[%s1727_s8 + $0x1a8] sm:$0xff]  ;;  %v278_v46 = vld [vmem:[%s1727_s8 + $0xa0] sm:$0xff]  ;;  %v261_v48 = vld [vmem:[%s1727_s8 + $0x18] sm:$0xff] }
  0x2e   : > { %840 = vmatpush.msra.mxu3 %v315_v27  ;;  %821 = vmatpush.msra.mxu2 %v298_v29  ;;  %v310_v47 = vld [vmem:[%s1727_s8 + $0x1a0] sm:$0xff]  ;;  %v293_v49 = vld [vmem:[%s1727_s8 + $0x118] sm:$0xff]  ;;  %v260_v52 = vld [vmem:[%s1727_s8 + $0x10] sm:$0xff] }
  0x2f   : > { %801 = vmatpush.msra.mxu1 %v282_v30  ;;  %782 = vmatpush.msra.mxu0 %v265_v32  ;;  %v277_v50 = vld [vmem:[%s1727_s8 + $0x98] sm:$0xff]  ;;  %v292_v53 = vld [vmem:[%s1727_s8 + $0x110] sm:$0xff]  ;;  %v259_v56 = vld [vmem:[%s1727_s8 + $0x8] sm:$0xff] }
  0x30   : > { %841 = vmatpush.msra.mxu3 %v314_v31  ;;  %822 = vmatpush.msra.mxu2 %v297_v33  ;;  %v309_v51 = vld [vmem:[%s1727_s8 + $0x198] sm:$0xff]  ;;  %v276_v54 = vld [vmem:[%s1727_s8 + $0x90] sm:$0xff]  ;;  %v291_v57 = vld [vmem:[%s1727_s8 + $0x108] sm:$0xff] }
  0x31   : > { %802 = vmatpush.msra.mxu1 %v281_v34  ;;  %783 = vmatpush.msra.mxu0 %v264_v36  ;;  %v308_v55 = vld [vmem:[%s1727_s8 + $0x190] sm:$0xff]  ;;  %v275_v58 = vld [vmem:[%s1727_s8 + $0x88] sm:$0xff]  ;;  %v258_v60 = vld [vmem:[%s1727_s8] sm:$0xff] }
  0x32   : > { %842 = vmatpush.msra.mxu3 %v313_v35  ;;  %823 = vmatpush.msra.mxu2 %v296_v37  ;;  %v307_v59 = vld [vmem:[%s1727_s8 + $0x188] sm:$0xff]  ;;  %v290_v61 = vld [vmem:[%s1727_s8 + $0x100] sm:$0xff]  ;;  %v337_v62 = vld [vmem:[%s1727_s8 + $0x278] sm:$0xff] }
  0x33   : > { %803 = vmatpush.msra.mxu1 %v280_v38  ;;  %784 = vmatpush.msra.mxu0 %v263_v40  ;;  %v369_v63 = vld [vmem:[%s1727_s8 + $0x378] sm:$0xff]  ;;  %v274_v0 = vld [vmem:[%s1727_s8 + $0x80] sm:$0xff]  ;;  %v336_v2 = vld [vmem:[%s1727_s8 + $0x270] sm:$0xff] }
  0x34   : > { %843 = vmatpush.msra.mxu3 %v312_v39  ;;  %824 = vmatpush.msra.mxu2 %v295_v41  ;;  %v306_v1 = vld [vmem:[%s1727_s8 + $0x180] sm:$0xff]  ;;  %v353_v3 = vld [vmem:[%s1727_s8 + $0x2f8] sm:$0xff]  ;;  %v368_v4 = vld [vmem:[%s1727_s8 + $0x370] sm:$0xff] }
  0x35   : > { %804 = vmatpush.msra.mxu1 %v279_v42  ;;  %785 = vmatpush.msra.mxu0 %v262_v44  ;;  %v385_v5 = vld [vmem:[%s1727_s8 + $0x3f8] sm:$0xff]  ;;  %v335_v6 = vld [vmem:[%s1727_s8 + $0x268] sm:$0xff]  ;;  %v352_v7 = vld [vmem:[%s1727_s8 + $0x2f0] sm:$0xff] }
  0x36   : > { %844 = vmatpush.msra.mxu3 %v311_v43  ;;  %825 = vmatpush.msra.mxu2 %v294_v45  ;;  %v367_v8 = vld [vmem:[%s1727_s8 + $0x368] sm:$0xff]  ;;  %v384_v9 = vld [vmem:[%s1727_s8 + $0x3f0] sm:$0xff]  ;;  %v334_v10 = vld [vmem:[%s1727_s8 + $0x260] sm:$0xff] }
  0x37   : > { %805 = vmatpush.msra.mxu1 %v278_v46  ;;  %786 = vmatpush.msra.mxu0 %v261_v48  ;;  %v351_v11 = vld [vmem:[%s1727_s8 + $0x2e8] sm:$0xff]  ;;  %v366_v12 = vld [vmem:[%s1727_s8 + $0x360] sm:$0xff]  ;;  %v333_v14 = vld [vmem:[%s1727_s8 + $0x258] sm:$0xff] }
  0x38   : > { %845 = vmatpush.msra.mxu3 %v310_v47  ;;  %826 = vmatpush.msra.mxu2 %v293_v49  ;;  %v383_v13 = vld [vmem:[%s1727_s8 + $0x3e8] sm:$0xff]  ;;  %v350_v15 = vld [vmem:[%s1727_s8 + $0x2e0] sm:$0xff]  ;;  %v365_v16 = vld [vmem:[%s1727_s8 + $0x358] sm:$0xff] }
  0x39   : > { %806 = vmatpush.msra.mxu1 %v277_v50  ;;  %787 = vmatpush.msra.mxu0 %v260_v52  ;;  %v382_v17 = vld [vmem:[%s1727_s8 + $0x3e0] sm:$0xff]  ;;  %v332_v18 = vld [vmem:[%s1727_s8 + $0x250] sm:$0xff]  ;;  %v349_v19 = vld [vmem:[%s1727_s8 + $0x2d8] sm:$0xff] }
  0x3a   : > { %846 = vmatpush.msra.mxu3 %v309_v51  ;;  %827 = vmatpush.msra.mxu2 %v292_v53  ;;  %v364_v20 = vld [vmem:[%s1727_s8 + $0x350] sm:$0xff]  ;;  %v381_v21 = vld [vmem:[%s1727_s8 + $0x3d8] sm:$0xff]  ;;  %v331_v22 = vld [vmem:[%s1727_s8 + $0x248] sm:$0xff] }
  0x3b   : > { %807 = vmatpush.msra.mxu1 %v276_v54  ;;  %788 = vmatpush.msra.mxu0 %v259_v56  ;;  %v348_v23 = vld [vmem:[%s1727_s8 + $0x2d0] sm:$0xff]  ;;  %v363_v24 = vld [vmem:[%s1727_s8 + $0x348] sm:$0xff]  ;;  %v330_v26 = vld [vmem:[%s1727_s8 + $0x240] sm:$0xff] }
  0x3c   : > { %847 = vmatpush.msra.mxu3 %v308_v55  ;;  %828 = vmatpush.msra.mxu2 %v291_v57  ;;  %v380_v25 = vld [vmem:[%s1727_s8 + $0x3d0] sm:$0xff]  ;;  %v347_v27 = vld [vmem:[%s1727_s8 + $0x2c8] sm:$0xff]  ;;  %v362_v28 = vld [vmem:[%s1727_s8 + $0x340] sm:$0xff] }
  0x3d   : > { %808 = vmatpush.msra.mxu1 %v275_v58  ;;  %789 = vmatpush.msra.mxu0 %v258_v60  ;;  %v379_v29 = vld [vmem:[%s1727_s8 + $0x3c8] sm:$0xff]  ;;  %v329_v30 = vld [vmem:[%s1727_s8 + $0x238] sm:$0xff]  ;;  %v346_v31 = vld [vmem:[%s1727_s8 + $0x2c0] sm:$0xff] }
  0x3e   : > { %848 = vmatpush.msra.mxu3 %v307_v59  ;;  %829 = vmatpush.msra.mxu2 %v290_v61  ;;  %v361_v32 = vld [vmem:[%s1727_s8 + $0x338] sm:$0xff]  ;;  %v378_v33 = vld [vmem:[%s1727_s8 + $0x3c0] sm:$0xff]  ;;  %v328_v34 = vld [vmem:[%s1727_s8 + $0x230] sm:$0xff] }
  0x3f   : > { %854 = vmatpush.msrb.mxu0 %v337_v62  ;;  %809 = vmatpush.msra.mxu1 %v274_v0  ;;  %v345_v35 = vld [vmem:[%s1727_s8 + $0x2b8] sm:$0xff]  ;;  %v360_v36 = vld [vmem:[%s1727_s8 + $0x330] sm:$0xff]  ;;  %v327_v38 = vld [vmem:[%s1727_s8 + $0x228] sm:$0xff] }
  0x40   : > { %894 = vmatpush.msrb.mxu2 %v369_v63  ;;  %849 = vmatpush.msra.mxu3 %v306_v1  ;;  %v377_v37 = vld [vmem:[%s1727_s8 + $0x3b8] sm:$0xff]  ;;  %v344_v39 = vld [vmem:[%s1727_s8 + $0x2b0] sm:$0xff]  ;;  %v359_v40 = vld [vmem:[%s1727_s8 + $0x328] sm:$0xff] }
  0x41   : > { %855 = vmatpush.msrb.mxu0 %v336_v2  ;;  %874 = vmatpush.msrb.mxu1 %v353_v3  ;;  %v376_v41 = vld [vmem:[%s1727_s8 + $0x3b0] sm:$0xff]  ;;  %v326_v42 = vld [vmem:[%s1727_s8 + $0x220] sm:$0xff]  ;;  %v343_v43 = vld [vmem:[%s1727_s8 + $0x2a8] sm:$0xff] }
  0x42   : > { %895 = vmatpush.msrb.mxu2 %v368_v4  ;;  %914 = vmatpush.msrb.mxu3 %v385_v5  ;;  %v358_v44 = vld [vmem:[%s1727_s8 + $0x320] sm:$0xff]  ;;  %v375_v45 = vld [vmem:[%s1727_s8 + $0x3a8] sm:$0xff]  ;;  %v325_v46 = vld [vmem:[%s1727_s8 + $0x218] sm:$0xff] }
  0x43   : > { %856 = vmatpush.msrb.mxu0 %v335_v6  ;;  %875 = vmatpush.msrb.mxu1 %v352_v7  ;;  %v342_v47 = vld [vmem:[%s1727_s8 + $0x2a0] sm:$0xff]  ;;  %v357_v48 = vld [vmem:[%s1727_s8 + $0x318] sm:$0xff]  ;;  %v324_v50 = vld [vmem:[%s1727_s8 + $0x210] sm:$0xff] }
  0x44   : > { %896 = vmatpush.msrb.mxu2 %v367_v8  ;;  %915 = vmatpush.msrb.mxu3 %v384_v9  ;;  %v374_v49 = vld [vmem:[%s1727_s8 + $0x3a0] sm:$0xff]  ;;  %v341_v51 = vld [vmem:[%s1727_s8 + $0x298] sm:$0xff]  ;;  %v356_v52 = vld [vmem:[%s1727_s8 + $0x310] sm:$0xff] }
  0x45   : > { %857 = vmatpush.msrb.mxu0 %v334_v10  ;;  %876 = vmatpush.msrb.mxu1 %v351_v11  ;;  %v373_v53 = vld [vmem:[%s1727_s8 + $0x398] sm:$0xff]  ;;  %v323_v54 = vld [vmem:[%s1727_s8 + $0x208] sm:$0xff]  ;;  %v340_v55 = vld [vmem:[%s1727_s8 + $0x290] sm:$0xff] }
  0x46   : > { %897 = vmatpush.msrb.mxu2 %v366_v12  ;;  %916 = vmatpush.msrb.mxu3 %v383_v13  ;;  %v355_v56 = vld [vmem:[%s1727_s8 + $0x308] sm:$0xff]  ;;  %v372_v57 = vld [vmem:[%s1727_s8 + $0x390] sm:$0xff]  ;;  %v322_v58 = vld [vmem:[%s1727_s8 + $0x200] sm:$0xff] }
  0x47   : > { %858 = vmatpush.msrb.mxu0 %v333_v14  ;;  %877 = vmatpush.msrb.mxu1 %v350_v15  ;;  %v339_v59 = vld [vmem:[%s1727_s8 + $0x288] sm:$0xff]  ;;  %v354_v60 = vld [vmem:[%s1727_s8 + $0x300] sm:$0xff]  ;;  %v228_v63 = vld [vmem:[%s1861_s13 + $0x10] sm:$0xff] }
  0x48   : > { %898 = vmatpush.msrb.mxu2 %v365_v16  ;;  %917 = vmatpush.msrb.mxu3 %v382_v17  ;;  %v371_v61 = vld [vmem:[%s1727_s8 + $0x388] sm:$0xff]  ;;  %v226_v62 = vld [vmem:[%s1861_s13] sm:$0xff]  ;;  %v401_v0 = vld [vmem:[%s1727_s8 + $0x478] sm:$0xff] }
  0x49   : > { %859 = vmatpush.msrb.mxu0 %v332_v18  ;;  %878 = vmatpush.msrb.mxu1 %v349_v19  ;;  %v433_v1 = vld [vmem:[%s1727_s8 + $0x578] sm:$0xff]  ;;  %v338_v2 = vld [vmem:[%s1727_s8 + $0x280] sm:$0xff]  ;;  %v227_v4 = vld [vmem:[%s1861_s13 + $0x8] sm:$0xff] }
  0x4a   : > { %899 = vmatpush.msrb.mxu2 %v364_v20  ;;  %918 = vmatpush.msrb.mxu3 %v381_v21  ;;  %v370_v3 = vld [vmem:[%s1727_s8 + $0x380] sm:$0xff]  ;;  %v229_v5 = vld [vmem:[%s1861_s13 + $0x18] sm:$0xff]  ;;  %v400_v6 = vld [vmem:[%s1727_s8 + $0x470] sm:$0xff] }
  0x4b   : > { %860 = vmatpush.msrb.mxu0 %v331_v22  ;;  %879 = vmatpush.msrb.mxu1 %v348_v23  ;;  %v417_v7 = vld [vmem:[%s1727_s8 + $0x4f8] sm:$0xff]  ;;  %v432_v8 = vld [vmem:[%s1727_s8 + $0x570] sm:$0xff]  ;;  %v399_v10 = vld [vmem:[%s1727_s8 + $0x468] sm:$0xff] }
  0x4c   : > { %900 = vmatpush.msrb.mxu2 %v363_v24  ;;  %919 = vmatpush.msrb.mxu3 %v380_v25  ;;  %v449_v9 = vld [vmem:[%s1727_s8 + $0x5f8] sm:$0xff]  ;;  %v416_v11 = vld [vmem:[%s1727_s8 + $0x4f0] sm:$0xff]  ;;  %v431_v12 = vld [vmem:[%s1727_s8 + $0x568] sm:$0xff] }
  0x4d   : > { %861 = vmatpush.msrb.mxu0 %v330_v26  ;;  %880 = vmatpush.msrb.mxu1 %v347_v27  ;;  %v448_v13 = vld [vmem:[%s1727_s8 + $0x5f0] sm:$0xff]  ;;  %v398_v14 = vld [vmem:[%s1727_s8 + $0x460] sm:$0xff]  ;;  %v415_v15 = vld [vmem:[%s1727_s8 + $0x4e8] sm:$0xff] }
  0x4e   : > { %901 = vmatpush.msrb.mxu2 %v362_v28  ;;  %920 = vmatpush.msrb.mxu3 %v379_v29  ;;  %v430_v16 = vld [vmem:[%s1727_s8 + $0x560] sm:$0xff]  ;;  %v447_v17 = vld [vmem:[%s1727_s8 + $0x5e8] sm:$0xff]  ;;  %v232_v18 = vld [vmem:[%s1861_s13 + $0x30] sm:$0xff] }
  0x4f   : > { %862 = vmatpush.msrb.mxu0 %v329_v30  ;;  %881 = vmatpush.msrb.mxu1 %v346_v31  ;;  %v397_v19 = vld [vmem:[%s1727_s8 + $0x458] sm:$0xff]  ;;  %v414_v20 = vld [vmem:[%s1727_s8 + $0x4e0] sm:$0xff]  ;;  %v396_v25 = vld [vmem:[%s1727_s8 + $0x450] sm:$0xff] }
  0x50   : > { %902 = vmatpush.msrb.mxu2 %v361_v32  ;;  %921 = vmatpush.msrb.mxu3 %v378_v33  ;;  %v429_v21 = vld [vmem:[%s1727_s8 + $0x558] sm:$0xff]  ;;  %v446_v22 = vld [vmem:[%s1727_s8 + $0x5e0] sm:$0xff]  ;;  %v428_v27 = vld [vmem:[%s1727_s8 + $0x550] sm:$0xff] }
  0x51   : > { %863 = vmatpush.msrb.mxu0 %v328_v34  ;;  %882 = vmatpush.msrb.mxu1 %v345_v35  ;;  %v230_v23 = vld [vmem:[%s1861_s13 + $0x20] sm:$0xff]  ;;  %v233_v24 = vld [vmem:[%s1861_s13 + $0x38] sm:$0xff]  ;;  %v231_v29 = vld [vmem:[%s1861_s13 + $0x28] sm:$0xff] }
  0x52   : > { %903 = vmatpush.msrb.mxu2 %v360_v36  ;;  %922 = vmatpush.msrb.mxu3 %v377_v37  ;;  %v413_v26 = vld [vmem:[%s1727_s8 + $0x4d8] sm:$0xff]  ;;  %v395_v30 = vld [vmem:[%s1727_s8 + $0x448] sm:$0xff]  ;;  %v412_v31 = vld [vmem:[%s1727_s8 + $0x4d0] sm:$0xff] }
  0x53   : > { %864 = vmatpush.msrb.mxu0 %v327_v38  ;;  %883 = vmatpush.msrb.mxu1 %v344_v39  ;;  %v445_v28 = vld [vmem:[%s1727_s8 + $0x5d8] sm:$0xff]  ;;  %v427_v32 = vld [vmem:[%s1727_s8 + $0x548] sm:$0xff]  ;;  %v444_v33 = vld [vmem:[%s1727_s8 + $0x5d0] sm:$0xff] }
  0x54   : > { %904 = vmatpush.msrb.mxu2 %v359_v40  ;;  %923 = vmatpush.msrb.mxu3 %v376_v41  ;;  %v394_v34 = vld [vmem:[%s1727_s8 + $0x440] sm:$0xff]  ;;  %v411_v35 = vld [vmem:[%s1727_s8 + $0x4c8] sm:$0xff]  ;;  %v393_v38 = vld [vmem:[%s1727_s8 + $0x438] sm:$0xff] }
  0x55   : > { %865 = vmatpush.msrb.mxu0 %v326_v42  ;;  %884 = vmatpush.msrb.mxu1 %v343_v43  ;;  %v426_v36 = vld [vmem:[%s1727_s8 + $0x540] sm:$0xff]  ;;  %v443_v37 = vld [vmem:[%s1727_s8 + $0x5c8] sm:$0xff]  ;;  %v425_v40 = vld [vmem:[%s1727_s8 + $0x538] sm:$0xff] }
  0x56   : > { %905 = vmatpush.msrb.mxu2 %v358_v44  ;;  %924 = vmatpush.msrb.mxu3 %v375_v45  ;;  %v410_v39 = vld [vmem:[%s1727_s8 + $0x4c0] sm:$0xff]  ;;  %v392_v42 = vld [vmem:[%s1727_s8 + $0x430] sm:$0xff]  ;;  %v409_v43 = vld [vmem:[%s1727_s8 + $0x4b8] sm:$0xff] }
  0x57   : > { %866 = vmatpush.msrb.mxu0 %v325_v46  ;;  %885 = vmatpush.msrb.mxu1 %v342_v47  ;;  %v442_v41 = vld [vmem:[%s1727_s8 + $0x5c0] sm:$0xff]  ;;  %v424_v44 = vld [vmem:[%s1727_s8 + $0x530] sm:$0xff]  ;;  %v441_v45 = vld [vmem:[%s1727_s8 + $0x5b8] sm:$0xff] }
  0x58   : > { %906 = vmatpush.msrb.mxu2 %v357_v48  ;;  %925 = vmatpush.msrb.mxu3 %v374_v49  ;;  %v391_v46 = vld [vmem:[%s1727_s8 + $0x428] sm:$0xff]  ;;  %v408_v47 = vld [vmem:[%s1727_s8 + $0x4b0] sm:$0xff] }
  0x59   : > { %867 = vmatpush.msrb.mxu0 %v324_v50  ;;  %886 = vmatpush.msrb.mxu1 %v341_v51  ;;  %v423_v48 = vld [vmem:[%s1727_s8 + $0x528] sm:$0xff]  ;;  %v440_v49 = vld [vmem:[%s1727_s8 + $0x5b0] sm:$0xff]  ;;  %v390_v50 = vld [vmem:[%s1727_s8 + $0x420] sm:$0xff] }
  0x5a   : > { %907 = vmatpush.msrb.mxu2 %v356_v52  ;;  %926 = vmatpush.msrb.mxu3 %v373_v53  ;;  %v407_v51 = vld [vmem:[%s1727_s8 + $0x4a8] sm:$0xff]  ;;  %v422_v52 = vld [vmem:[%s1727_s8 + $0x520] sm:$0xff] }
  0x5b   : > { %868 = vmatpush.msrb.mxu0 %v323_v54  ;;  %887 = vmatpush.msrb.mxu1 %v340_v55  ;;  %v439_v53 = vld [vmem:[%s1727_s8 + $0x5a8] sm:$0xff]  ;;  %v389_v54 = vld [vmem:[%s1727_s8 + $0x418] sm:$0xff]  ;;  %v406_v55 = vld [vmem:[%s1727_s8 + $0x4a0] sm:$0xff] }
  0x5c   : > { %908 = vmatpush.msrb.mxu2 %v355_v56  ;;  %927 = vmatpush.msrb.mxu3 %v372_v57  ;;  %v421_v56 = vld [vmem:[%s1727_s8 + $0x518] sm:$0xff]  ;;  %v438_v57 = vld [vmem:[%s1727_s8 + $0x5a0] sm:$0xff] }
  0x5d   : > { %869 = vmatpush.msrb.mxu0 %v322_v58  ;;  %888 = vmatpush.msrb.mxu1 %v339_v59  ;;  %v388_v58 = vld [vmem:[%s1727_s8 + $0x410] sm:$0xff]  ;;  %v405_v59 = vld [vmem:[%s1727_s8 + $0x498] sm:$0xff] }
  0x5e   : > { %909 = vmatpush.msrb.mxu2 %v354_v60  ;;  %928 = vmatpush.msrb.mxu3 %v371_v61  ;;  %v420_v60 = vld [vmem:[%s1727_s8 + $0x510] sm:$0xff]  ;;  %v437_v61 = vld [vmem:[%s1727_s8 + $0x598] sm:$0xff] }
  0x5f   : > { %790 = vmatmul.f32.vlgmr.msra.gmra.mxu0 %v226_v62  ;;  %830 = vmatmul.f32.vlgmr.msra.gmra.mxu2 %v228_v63  ;;  %v387_v62 = vld [vmem:[%s1727_s8 + $0x408] sm:$0xff]  ;;  %v404_v63 = vld [vmem:[%s1727_s8 + $0x490] sm:$0xff] }
  0x60   : > { %934 = vmatpush.msra.mxu0 %v401_v0  ;;  %974 = vmatpush.msra.mxu2 %v433_v1  ;;  %v419_v0 = vld [vmem:[%s1727_s8 + $0x508] sm:$0xff]  ;;  %v436_v1 = vld [vmem:[%s1727_s8 + $0x590] sm:$0xff] }
  0x61   : > { %889 = vmatpush.msrb.mxu1 %v338_v2  ;;  %929 = vmatpush.msrb.mxu3 %v370_v3  ;;  %v386_v2 = vld [vmem:[%s1727_s8 + $0x400] sm:$0xff]  ;;  %v403_v3 = vld [vmem:[%s1727_s8 + $0x488] sm:$0xff] }
  0x62   : > { %810 = vmatmul.f32.vlgmr.msra.gmra.mxu1 %v227_v4  ;;  %850 = vmatmul.f32.vlgmr.msra.gmra.mxu3 %v229_v5  ;;  %v418_v4 = vld [vmem:[%s1727_s8 + $0x500] sm:$0xff]  ;;  %v435_v5 = vld [vmem:[%s1727_s8 + $0x588] sm:$0xff] }
  0x63   : > { %935 = vmatpush.msra.mxu0 %v400_v6  ;;  %954 = vmatpush.msra.mxu1 %v417_v7  ;;  %v234_v6 = vld [vmem:[%s1861_s13 + $0x40] sm:$0xff]  ;;  %v236_v7 = vld [vmem:[%s1861_s13 + $0x50] sm:$0xff] }
  0x64   : > { %975 = vmatpush.msra.mxu2 %v432_v8  ;;  %994 = vmatpush.msra.mxu3 %v449_v9  ;;  %v465_v8 = vld [vmem:[%s1727_s8 + $0x678] sm:$0xff] }
  0x65   : > { %936 = vmatpush.msra.mxu0 %v399_v10  ;;  %955 = vmatpush.msra.mxu1 %v416_v11  ;;  %v497_v9 = vld [vmem:[%s1727_s8 + $0x778] sm:$0xff]  ;;  %v402_v10 = vld [vmem:[%s1727_s8 + $0x480] sm:$0xff] }
  0x66   : > { %976 = vmatpush.msra.mxu2 %v431_v12  ;;  %995 = vmatpush.msra.mxu3 %v448_v13  ;;  %v434_v11 = vld [vmem:[%s1727_s8 + $0x580] sm:$0xff]  ;;  %v235_v12 = vld [vmem:[%s1861_s13 + $0x48] sm:$0xff]  ;;  %v237_v13 = vld [vmem:[%s1861_s13 + $0x58] sm:$0xff] }
  0x67   : > { %937 = vmatpush.msra.mxu0 %v398_v14  ;;  %956 = vmatpush.msra.mxu1 %v415_v15  ;;  %v464_v14 = vld [vmem:[%s1727_s8 + $0x670] sm:$0xff]  ;;  %v481_v15 = vld [vmem:[%s1727_s8 + $0x6f8] sm:$0xff] }
  0x68   : > { %977 = vmatpush.msra.mxu2 %v430_v16  ;;  %996 = vmatpush.msra.mxu3 %v447_v17  ;;  %v496_v16 = vld [vmem:[%s1727_s8 + $0x770] sm:$0xff]  ;;  %v513_v17 = vld [vmem:[%s1727_s8 + $0x7f8] sm:$0xff] }
  0x69   : > { %910 = vmatmul.f32.vlgmr.msrb.gmra.mxu2 %v232_v18  ;;  %938 = vmatpush.msra.mxu0 %v397_v19  ;;  %v463_v18 = vld [vmem:[%s1727_s8 + $0x668] sm:$0xff]  ;;  %v480_v19 = vld [vmem:[%s1727_s8 + $0x6f0] sm:$0xff] }
  0x6a   : > { %957 = vmatpush.msra.mxu1 %v414_v20  ;;  %978 = vmatpush.msra.mxu2 %v429_v21  ;;  %v495_v20 = vld [vmem:[%s1727_s8 + $0x768] sm:$0xff]  ;;  %v512_v21 = vld [vmem:[%s1727_s8 + $0x7f0] sm:$0xff] }
  0x6b   : > { %997 = vmatpush.msra.mxu3 %v446_v22  ;;  %870 = vmatmul.f32.vlgmr.msrb.gmra.mxu0 %v230_v23  ;;  %v462_v22 = vld [vmem:[%s1727_s8 + $0x660] sm:$0xff]  ;;  %v479_v23 = vld [vmem:[%s1727_s8 + $0x6e8] sm:$0xff] }
  0x6c   : > { %930 = vmatmul.f32.vlgmr.msrb.gmra.mxu3 %v233_v24  ;;  %939 = vmatpush.msra.mxu0 %v396_v25  ;;  %v494_v24 = vld [vmem:[%s1727_s8 + $0x760] sm:$0xff]  ;;  %v511_v25 = vld [vmem:[%s1727_s8 + $0x7e8] sm:$0xff] }
  0x6d   : > { %958 = vmatpush.msra.mxu1 %v413_v26  ;;  %979 = vmatpush.msra.mxu2 %v428_v27  ;;  %v461_v26 = vld [vmem:[%s1727_s8 + $0x658] sm:$0xff]  ;;  %v478_v27 = vld [vmem:[%s1727_s8 + $0x6e0] sm:$0xff] }
  0x6e   : > { %998 = vmatpush.msra.mxu3 %v445_v28  ;;  %890 = vmatmul.f32.vlgmr.msrb.gmra.mxu1 %v231_v29  ;;  %v493_v28 = vld [vmem:[%s1727_s8 + $0x758] sm:$0xff]  ;;  %v510_v29 = vld [vmem:[%s1727_s8 + $0x7e0] sm:$0xff] }
  0x6f   : > { %940 = vmatpush.msra.mxu0 %v395_v30  ;;  %959 = vmatpush.msra.mxu1 %v412_v31  ;;  %v460_v30 = vld [vmem:[%s1727_s8 + $0x650] sm:$0xff]  ;;  %v477_v31 = vld [vmem:[%s1727_s8 + $0x6d8] sm:$0xff] }
  0x70   : > { %980 = vmatpush.msra.mxu2 %v427_v32  ;;  %999 = vmatpush.msra.mxu3 %v444_v33  ;;  %v492_v32 = vld [vmem:[%s1727_s8 + $0x750] sm:$0xff]  ;;  %v509_v33 = vld [vmem:[%s1727_s8 + $0x7d8] sm:$0xff] }
  0x71   : > { %941 = vmatpush.msra.mxu0 %v394_v34  ;;  %960 = vmatpush.msra.mxu1 %v411_v35  ;;  %v459_v34 = vld [vmem:[%s1727_s8 + $0x648] sm:$0xff]  ;;  %v476_v35 = vld [vmem:[%s1727_s8 + $0x6d0] sm:$0xff] }
  0x72   : > { %981 = vmatpush.msra.mxu2 %v426_v36  ;;  %1000 = vmatpush.msra.mxu3 %v443_v37  ;;  %v491_v36 = vld [vmem:[%s1727_s8 + $0x748] sm:$0xff]  ;;  %v508_v37 = vld [vmem:[%s1727_s8 + $0x7d0] sm:$0xff] }
  0x73   : > { %942 = vmatpush.msra.mxu0 %v393_v38  ;;  %961 = vmatpush.msra.mxu1 %v410_v39  ;;  %v458_v38 = vld [vmem:[%s1727_s8 + $0x640] sm:$0xff]  ;;  %v475_v39 = vld [vmem:[%s1727_s8 + $0x6c8] sm:$0xff] }
  0x74   : > { %982 = vmatpush.msra.mxu2 %v425_v40  ;;  %1001 = vmatpush.msra.mxu3 %v442_v41  ;;  %v490_v40 = vld [vmem:[%s1727_s8 + $0x740] sm:$0xff]  ;;  %v507_v41 = vld [vmem:[%s1727_s8 + $0x7c8] sm:$0xff] }
  0x75   : > { %943 = vmatpush.msra.mxu0 %v392_v42  ;;  %962 = vmatpush.msra.mxu1 %v409_v43  ;;  %v457_v42 = vld [vmem:[%s1727_s8 + $0x638] sm:$0xff]  ;;  %v474_v43 = vld [vmem:[%s1727_s8 + $0x6c0] sm:$0xff] }
  0x76   : > { %983 = vmatpush.msra.mxu2 %v424_v44  ;;  %1002 = vmatpush.msra.mxu3 %v441_v45  ;;  %v489_v44 = vld [vmem:[%s1727_s8 + $0x738] sm:$0xff]  ;;  %v506_v45 = vld [vmem:[%s1727_s8 + $0x7c0] sm:$0xff] }
  0x77   : > { %944 = vmatpush.msra.mxu0 %v391_v46  ;;  %963 = vmatpush.msra.mxu1 %v408_v47  ;;  %v456_v46 = vld [vmem:[%s1727_s8 + $0x630] sm:$0xff]  ;;  %v473_v47 = vld [vmem:[%s1727_s8 + $0x6b8] sm:$0xff] }
  0x78   : > { %984 = vmatpush.msra.mxu2 %v423_v48  ;;  %1003 = vmatpush.msra.mxu3 %v440_v49  ;;  %v488_v48 = vld [vmem:[%s1727_s8 + $0x730] sm:$0xff]  ;;  %v505_v49 = vld [vmem:[%s1727_s8 + $0x7b8] sm:$0xff] }
  0x79   : > { %945 = vmatpush.msra.mxu0 %v390_v50  ;;  %964 = vmatpush.msra.mxu1 %v407_v51  ;;  %v455_v50 = vld [vmem:[%s1727_s8 + $0x628] sm:$0xff]  ;;  %v472_v51 = vld [vmem:[%s1727_s8 + $0x6b0] sm:$0xff] }
  0x7a   : > { %985 = vmatpush.msra.mxu2 %v422_v52  ;;  %1004 = vmatpush.msra.mxu3 %v439_v53  ;;  %v487_v52 = vld [vmem:[%s1727_s8 + $0x728] sm:$0xff]  ;;  %v504_v53 = vld [vmem:[%s1727_s8 + $0x7b0] sm:$0xff] }
  0x7b   : > { %946 = vmatpush.msra.mxu0 %v389_v54  ;;  %965 = vmatpush.msra.mxu1 %v406_v55  ;;  %v454_v54 = vld [vmem:[%s1727_s8 + $0x620] sm:$0xff]  ;;  %v471_v55 = vld [vmem:[%s1727_s8 + $0x6a8] sm:$0xff] }
  0x7c   : > { %986 = vmatpush.msra.mxu2 %v421_v56  ;;  %1005 = vmatpush.msra.mxu3 %v438_v57  ;;  %v486_v56 = vld [vmem:[%s1727_s8 + $0x720] sm:$0xff]  ;;  %v503_v57 = vld [vmem:[%s1727_s8 + $0x7a8] sm:$0xff] }
  0x7d   : > { %947 = vmatpush.msra.mxu0 %v388_v58  ;;  %966 = vmatpush.msra.mxu1 %v405_v59  ;;  %v453_v58 = vld [vmem:[%s1727_s8 + $0x618] sm:$0xff]  ;;  %v470_v59 = vld [vmem:[%s1727_s8 + $0x6a0] sm:$0xff] }
  0x7e   : > { %987 = vmatpush.msra.mxu2 %v420_v60  ;;  %1006 = vmatpush.msra.mxu3 %v437_v61  ;;  %v485_v60 = vld [vmem:[%s1727_s8 + $0x718] sm:$0xff]  ;;  %v502_v61 = vld [vmem:[%s1727_s8 + $0x7a0] sm:$0xff] }
  0x7f   : > { %948 = vmatpush.msra.mxu0 %v387_v62  ;;  %967 = vmatpush.msra.mxu1 %v404_v63  ;;  %v452_v62 = vld [vmem:[%s1727_s8 + $0x610] sm:$0xff]  ;;  %v469_v63 = vld [vmem:[%s1727_s8 + $0x698] sm:$0xff] }
  0x80   : > { %988 = vmatpush.msra.mxu2 %v419_v0  ;;  %1007 = vmatpush.msra.mxu3 %v436_v1  ;;  %v484_v0 = vld [vmem:[%s1727_s8 + $0x710] sm:$0xff]  ;;  %v501_v1 = vld [vmem:[%s1727_s8 + $0x798] sm:$0xff] }
  0x81   : > { %949 = vmatpush.msra.mxu0 %v386_v2  ;;  %968 = vmatpush.msra.mxu1 %v403_v3  ;;  %v451_v2 = vld [vmem:[%s1727_s8 + $0x608] sm:$0xff]  ;;  %v468_v3 = vld [vmem:[%s1727_s8 + $0x690] sm:$0xff] }
  0x82   : > { %989 = vmatpush.msra.mxu2 %v418_v4  ;;  %1008 = vmatpush.msra.mxu3 %v435_v5  ;;  %v483_v4 = vld [vmem:[%s1727_s8 + $0x708] sm:$0xff]  ;;  %v500_v5 = vld [vmem:[%s1727_s8 + $0x790] sm:$0xff] }
  0x83   : > { %950 = vmatmul.f32.vlgmr.msra.gmra.mxu0 %v234_v6  ;;  %990 = vmatmul.f32.vlgmr.msra.gmra.mxu2 %v236_v7  ;;  %v450_v6 = vld [vmem:[%s1727_s8 + $0x600] sm:$0xff]  ;;  %v467_v7 = vld [vmem:[%s1727_s8 + $0x688] sm:$0xff] }
  0x84   : > { %1014 = vmatpush.msrb.mxu0 %v465_v8  ;;  %1054 = vmatpush.msrb.mxu2 %v497_v9  ;;  %v482_v8 = vld [vmem:[%s1727_s8 + $0x700] sm:$0xff]  ;;  %v499_v9 = vld [vmem:[%s1727_s8 + $0x788] sm:$0xff] }
  0x85   : > { %969 = vmatpush.msra.mxu1 %v402_v10  ;;  %1009 = vmatpush.msra.mxu3 %v434_v11  ;;  %v238_v10 = vld [vmem:[%s1861_s13 + $0x60] sm:$0xff]  ;;  %v240_v11 = vld [vmem:[%s1861_s13 + $0x70] sm:$0xff] }
  0x86   : > { %970 = vmatmul.f32.vlgmr.msra.gmra.mxu1 %v235_v12  ;;  %1010 = vmatmul.f32.vlgmr.msra.gmra.mxu3 %v237_v13  ;;  %v529_v12 = vld [vmem:[%s1727_s8 + $0x878] sm:$0xff] }
  0x87   : > { %1015 = vmatpush.msrb.mxu0 %v464_v14  ;;  %1034 = vmatpush.msrb.mxu1 %v481_v15  ;;  %v561_v13 = vld [vmem:[%s1727_s8 + $0x978] sm:$0xff]  ;;  %v466_v14 = vld [vmem:[%s1727_s8 + $0x680] sm:$0xff] }
  0x88   : > { %1055 = vmatpush.msrb.mxu2 %v496_v16  ;;  %1074 = vmatpush.msrb.mxu3 %v513_v17  ;;  %v498_v15 = vld [vmem:[%s1727_s8 + $0x780] sm:$0xff]  ;;  %v239_v16 = vld [vmem:[%s1861_s13 + $0x68] sm:$0xff]  ;;  %v241_v17 = vld [vmem:[%s1861_s13 + $0x78] sm:$0xff] }
  0x89   : > { %1016 = vmatpush.msrb.mxu0 %v463_v18  ;;  %1035 = vmatpush.msrb.mxu1 %v480_v19  ;;  %v528_v18 = vld [vmem:[%s1727_s8 + $0x870] sm:$0xff]  ;;  %v545_v19 = vld [vmem:[%s1727_s8 + $0x8f8] sm:$0xff] }
  0x8a   : > { %1056 = vmatpush.msrb.mxu2 %v495_v20  ;;  %1075 = vmatpush.msrb.mxu3 %v512_v21  ;;  %v560_v20 = vld [vmem:[%s1727_s8 + $0x970] sm:$0xff]  ;;  %v577_v21 = vld [vmem:[%s1727_s8 + $0x9f8] sm:$0xff] }
  0x8b   : > { %1017 = vmatpush.msrb.mxu0 %v462_v22  ;;  %1036 = vmatpush.msrb.mxu1 %v479_v23  ;;  %v527_v22 = vld [vmem:[%s1727_s8 + $0x868] sm:$0xff]  ;;  %v544_v23 = vld [vmem:[%s1727_s8 + $0x8f0] sm:$0xff] }
  0x8c   : > { %1057 = vmatpush.msrb.mxu2 %v494_v24  ;;  %1076 = vmatpush.msrb.mxu3 %v511_v25  ;;  %v559_v24 = vld [vmem:[%s1727_s8 + $0x968] sm:$0xff]  ;;  %v576_v25 = vld [vmem:[%s1727_s8 + $0x9f0] sm:$0xff] }
  0x8d   : > { %1018 = vmatpush.msrb.mxu0 %v461_v26  ;;  %1037 = vmatpush.msrb.mxu1 %v478_v27  ;;  %v526_v26 = vld [vmem:[%s1727_s8 + $0x860] sm:$0xff]  ;;  %v543_v27 = vld [vmem:[%s1727_s8 + $0x8e8] sm:$0xff] }
  0x8e   : > { %1058 = vmatpush.msrb.mxu2 %v493_v28  ;;  %1077 = vmatpush.msrb.mxu3 %v510_v29  ;;  %v558_v28 = vld [vmem:[%s1727_s8 + $0x960] sm:$0xff]  ;;  %v575_v29 = vld [vmem:[%s1727_s8 + $0x9e8] sm:$0xff] }
  0x8f   : > { %1019 = vmatpush.msrb.mxu0 %v460_v30  ;;  %1038 = vmatpush.msrb.mxu1 %v477_v31  ;;  %v525_v30 = vld [vmem:[%s1727_s8 + $0x858] sm:$0xff]  ;;  %v542_v31 = vld [vmem:[%s1727_s8 + $0x8e0] sm:$0xff] }
  0x90   : > { %1059 = vmatpush.msrb.mxu2 %v492_v32  ;;  %1078 = vmatpush.msrb.mxu3 %v509_v33  ;;  %v557_v32 = vld [vmem:[%s1727_s8 + $0x958] sm:$0xff]  ;;  %v574_v33 = vld [vmem:[%s1727_s8 + $0x9e0] sm:$0xff] }
  0x91   : > { %1020 = vmatpush.msrb.mxu0 %v459_v34  ;;  %1039 = vmatpush.msrb.mxu1 %v476_v35  ;;  %v524_v34 = vld [vmem:[%s1727_s8 + $0x850] sm:$0xff]  ;;  %v541_v35 = vld [vmem:[%s1727_s8 + $0x8d8] sm:$0xff] }
  0x92   : > { %1060 = vmatpush.msrb.mxu2 %v491_v36  ;;  %1079 = vmatpush.msrb.mxu3 %v508_v37  ;;  %v556_v36 = vld [vmem:[%s1727_s8 + $0x950] sm:$0xff]  ;;  %v573_v37 = vld [vmem:[%s1727_s8 + $0x9d8] sm:$0xff] }
  0x93   : > { %1021 = vmatpush.msrb.mxu0 %v458_v38  ;;  %1040 = vmatpush.msrb.mxu1 %v475_v39  ;;  %v523_v38 = vld [vmem:[%s1727_s8 + $0x848] sm:$0xff]  ;;  %v540_v39 = vld [vmem:[%s1727_s8 + $0x8d0] sm:$0xff] }
  0x94   : > { %1061 = vmatpush.msrb.mxu2 %v490_v40  ;;  %1080 = vmatpush.msrb.mxu3 %v507_v41  ;;  %v555_v40 = vld [vmem:[%s1727_s8 + $0x948] sm:$0xff]  ;;  %v572_v41 = vld [vmem:[%s1727_s8 + $0x9d0] sm:$0xff] }
  0x95   : > { %1022 = vmatpush.msrb.mxu0 %v457_v42  ;;  %1041 = vmatpush.msrb.mxu1 %v474_v43  ;;  %v522_v42 = vld [vmem:[%s1727_s8 + $0x840] sm:$0xff]  ;;  %v539_v43 = vld [vmem:[%s1727_s8 + $0x8c8] sm:$0xff] }
  0x96   : > { %1062 = vmatpush.msrb.mxu2 %v489_v44  ;;  %1081 = vmatpush.msrb.mxu3 %v506_v45  ;;  %v554_v44 = vld [vmem:[%s1727_s8 + $0x940] sm:$0xff]  ;;  %v571_v45 = vld [vmem:[%s1727_s8 + $0x9c8] sm:$0xff] }
  0x97   : > { %1023 = vmatpush.msrb.mxu0 %v456_v46  ;;  %1042 = vmatpush.msrb.mxu1 %v473_v47  ;;  %v521_v46 = vld [vmem:[%s1727_s8 + $0x838] sm:$0xff]  ;;  %v538_v47 = vld [vmem:[%s1727_s8 + $0x8c0] sm:$0xff] }
  0x98   : > { %1063 = vmatpush.msrb.mxu2 %v488_v48  ;;  %1082 = vmatpush.msrb.mxu3 %v505_v49  ;;  %v553_v48 = vld [vmem:[%s1727_s8 + $0x938] sm:$0xff]  ;;  %v570_v49 = vld [vmem:[%s1727_s8 + $0x9c0] sm:$0xff] }
  0x99   : > { %1024 = vmatpush.msrb.mxu0 %v455_v50  ;;  %1043 = vmatpush.msrb.mxu1 %v472_v51  ;;  %v520_v50 = vld [vmem:[%s1727_s8 + $0x830] sm:$0xff]  ;;  %v537_v51 = vld [vmem:[%s1727_s8 + $0x8b8] sm:$0xff] }
  0x9a   : > { %1064 = vmatpush.msrb.mxu2 %v487_v52  ;;  %1083 = vmatpush.msrb.mxu3 %v504_v53  ;;  %v552_v52 = vld [vmem:[%s1727_s8 + $0x930] sm:$0xff]  ;;  %v569_v53 = vld [vmem:[%s1727_s8 + $0x9b8] sm:$0xff] }
  0x9b   : > { %1025 = vmatpush.msrb.mxu0 %v454_v54  ;;  %1044 = vmatpush.msrb.mxu1 %v471_v55  ;;  %v519_v54 = vld [vmem:[%s1727_s8 + $0x828] sm:$0xff]  ;;  %v536_v55 = vld [vmem:[%s1727_s8 + $0x8b0] sm:$0xff] }
  0x9c   : > { %1065 = vmatpush.msrb.mxu2 %v486_v56  ;;  %1084 = vmatpush.msrb.mxu3 %v503_v57  ;;  %v551_v56 = vld [vmem:[%s1727_s8 + $0x928] sm:$0xff]  ;;  %v568_v57 = vld [vmem:[%s1727_s8 + $0x9b0] sm:$0xff] }
  0x9d   : > { %1026 = vmatpush.msrb.mxu0 %v453_v58  ;;  %1045 = vmatpush.msrb.mxu1 %v470_v59  ;;  %v518_v58 = vld [vmem:[%s1727_s8 + $0x820] sm:$0xff]  ;;  %v535_v59 = vld [vmem:[%s1727_s8 + $0x8a8] sm:$0xff] }
  0x9e   : > { %1066 = vmatpush.msrb.mxu2 %v485_v60  ;;  %1085 = vmatpush.msrb.mxu3 %v502_v61  ;;  %v550_v60 = vld [vmem:[%s1727_s8 + $0x920] sm:$0xff]  ;;  %v567_v61 = vld [vmem:[%s1727_s8 + $0x9a8] sm:$0xff] }
  0x9f   : > { %1027 = vmatpush.msrb.mxu0 %v452_v62  ;;  %1046 = vmatpush.msrb.mxu1 %v469_v63  ;;  %v517_v62 = vld [vmem:[%s1727_s8 + $0x818] sm:$0xff]  ;;  %v534_v63 = vld [vmem:[%s1727_s8 + $0x8a0] sm:$0xff] }
  0xa0   : > { %1067 = vmatpush.msrb.mxu2 %v484_v0  ;;  %1086 = vmatpush.msrb.mxu3 %v501_v1  ;;  %v549_v0 = vld [vmem:[%s1727_s8 + $0x918] sm:$0xff]  ;;  %v566_v1 = vld [vmem:[%s1727_s8 + $0x9a0] sm:$0xff] }
  0xa1   : > { %1028 = vmatpush.msrb.mxu0 %v451_v2  ;;  %1047 = vmatpush.msrb.mxu1 %v468_v3  ;;  %v516_v2 = vld [vmem:[%s1727_s8 + $0x810] sm:$0xff]  ;;  %v533_v3 = vld [vmem:[%s1727_s8 + $0x898] sm:$0xff] }
  0xa2   : > { %1068 = vmatpush.msrb.mxu2 %v483_v4  ;;  %1087 = vmatpush.msrb.mxu3 %v500_v5  ;;  %v548_v4 = vld [vmem:[%s1727_s8 + $0x910] sm:$0xff]  ;;  %v565_v5 = vld [vmem:[%s1727_s8 + $0x998] sm:$0xff] }
  0xa3   : > { %1029 = vmatpush.msrb.mxu0 %v450_v6  ;;  %1048 = vmatpush.msrb.mxu1 %v467_v7  ;;  %v515_v6 = vld [vmem:[%s1727_s8 + $0x808] sm:$0xff]  ;;  %v532_v7 = vld [vmem:[%s1727_s8 + $0x890] sm:$0xff] }
  0xa4   : > { %1069 = vmatpush.msrb.mxu2 %v482_v8  ;;  %1088 = vmatpush.msrb.mxu3 %v499_v9  ;;  %v547_v8 = vld [vmem:[%s1727_s8 + $0x908] sm:$0xff]  ;;  %v564_v9 = vld [vmem:[%s1727_s8 + $0x990] sm:$0xff] }
  0xa5   : > { %1030 = vmatmul.f32.vlgmr.msrb.gmra.mxu0 %v238_v10  ;;  %1070 = vmatmul.f32.vlgmr.msrb.gmra.mxu2 %v240_v11  ;;  %v514_v10 = vld [vmem:[%s1727_s8 + $0x800] sm:$0xff]  ;;  %v531_v11 = vld [vmem:[%s1727_s8 + $0x888] sm:$0xff] }
  0xa6   : > { %1094 = vmatpush.msra.mxu0 %v529_v12  ;;  %1134 = vmatpush.msra.mxu2 %v561_v13  ;;  %v546_v12 = vld [vmem:[%s1727_s8 + $0x900] sm:$0xff]  ;;  %v563_v13 = vld [vmem:[%s1727_s8 + $0x988] sm:$0xff] }
  0xa7   : > { %1049 = vmatpush.msrb.mxu1 %v466_v14  ;;  %1089 = vmatpush.msrb.mxu3 %v498_v15  ;;  %v242_v14 = vld [vmem:[%s1861_s13 + $0x80] sm:$0xff]  ;;  %v244_v15 = vld [vmem:[%s1861_s13 + $0x90] sm:$0xff] }
  0xa8   : > { %1050 = vmatmul.f32.vlgmr.msrb.gmra.mxu1 %v239_v16  ;;  %1090 = vmatmul.f32.vlgmr.msrb.gmra.mxu3 %v241_v17  ;;  %v593_v16 = vld [vmem:[%s1727_s8 + $0xa78] sm:$0xff] }
  0xa9   : > { %1095 = vmatpush.msra.mxu0 %v528_v18  ;;  %1114 = vmatpush.msra.mxu1 %v545_v19  ;;  %v625_v17 = vld [vmem:[%s1727_s8 + $0xb78] sm:$0xff]  ;;  %v530_v18 = vld [vmem:[%s1727_s8 + $0x880] sm:$0xff] }
  0xaa   : > { %1135 = vmatpush.msra.mxu2 %v560_v20  ;;  %1154 = vmatpush.msra.mxu3 %v577_v21  ;;  %v562_v19 = vld [vmem:[%s1727_s8 + $0x980] sm:$0xff]  ;;  %v243_v20 = vld [vmem:[%s1861_s13 + $0x88] sm:$0xff]  ;;  %v245_v21 = vld [vmem:[%s1861_s13 + $0x98] sm:$0xff] }
  0xab   : > { %1096 = vmatpush.msra.mxu0 %v527_v22  ;;  %1115 = vmatpush.msra.mxu1 %v544_v23  ;;  %v592_v22 = vld [vmem:[%s1727_s8 + $0xa70] sm:$0xff]  ;;  %v609_v23 = vld [vmem:[%s1727_s8 + $0xaf8] sm:$0xff] }
  0xac   : > { %1136 = vmatpush.msra.mxu2 %v559_v24  ;;  %1155 = vmatpush.msra.mxu3 %v576_v25  ;;  %v624_v24 = vld [vmem:[%s1727_s8 + $0xb70] sm:$0xff]  ;;  %v641_v25 = vld [vmem:[%s1727_s8 + $0xbf8] sm:$0xff] }
  0xad   : > { %1097 = vmatpush.msra.mxu0 %v526_v26  ;;  %1116 = vmatpush.msra.mxu1 %v543_v27  ;;  %v591_v26 = vld [vmem:[%s1727_s8 + $0xa68] sm:$0xff]  ;;  %v608_v27 = vld [vmem:[%s1727_s8 + $0xaf0] sm:$0xff] }
  0xae   : > { %1137 = vmatpush.msra.mxu2 %v558_v28  ;;  %1156 = vmatpush.msra.mxu3 %v575_v29  ;;  %v623_v28 = vld [vmem:[%s1727_s8 + $0xb68] sm:$0xff]  ;;  %v640_v29 = vld [vmem:[%s1727_s8 + $0xbf0] sm:$0xff] }
  0xaf   : > { %1098 = vmatpush.msra.mxu0 %v525_v30  ;;  %1117 = vmatpush.msra.mxu1 %v542_v31  ;;  %v590_v30 = vld [vmem:[%s1727_s8 + $0xa60] sm:$0xff]  ;;  %v607_v31 = vld [vmem:[%s1727_s8 + $0xae8] sm:$0xff] }
  0xb0   : > { %1138 = vmatpush.msra.mxu2 %v557_v32  ;;  %1157 = vmatpush.msra.mxu3 %v574_v33  ;;  %v622_v32 = vld [vmem:[%s1727_s8 + $0xb60] sm:$0xff]  ;;  %v639_v33 = vld [vmem:[%s1727_s8 + $0xbe8] sm:$0xff] }
  0xb1   : > { %1099 = vmatpush.msra.mxu0 %v524_v34  ;;  %1118 = vmatpush.msra.mxu1 %v541_v35  ;;  %v589_v34 = vld [vmem:[%s1727_s8 + $0xa58] sm:$0xff]  ;;  %v606_v35 = vld [vmem:[%s1727_s8 + $0xae0] sm:$0xff] }
  0xb2   : > { %1139 = vmatpush.msra.mxu2 %v556_v36  ;;  %1158 = vmatpush.msra.mxu3 %v573_v37  ;;  %v621_v36 = vld [vmem:[%s1727_s8 + $0xb58] sm:$0xff]  ;;  %v638_v37 = vld [vmem:[%s1727_s8 + $0xbe0] sm:$0xff] }
  0xb3   : > { %1100 = vmatpush.msra.mxu0 %v523_v38  ;;  %1119 = vmatpush.msra.mxu1 %v540_v39  ;;  %v588_v38 = vld [vmem:[%s1727_s8 + $0xa50] sm:$0xff]  ;;  %v605_v39 = vld [vmem:[%s1727_s8 + $0xad8] sm:$0xff] }
  0xb4   : > { %1140 = vmatpush.msra.mxu2 %v555_v40  ;;  %1159 = vmatpush.msra.mxu3 %v572_v41  ;;  %v620_v40 = vld [vmem:[%s1727_s8 + $0xb50] sm:$0xff]  ;;  %v637_v41 = vld [vmem:[%s1727_s8 + $0xbd8] sm:$0xff] }
  0xb5   : > { %1101 = vmatpush.msra.mxu0 %v522_v42  ;;  %1120 = vmatpush.msra.mxu1 %v539_v43  ;;  %v587_v42 = vld [vmem:[%s1727_s8 + $0xa48] sm:$0xff]  ;;  %v604_v43 = vld [vmem:[%s1727_s8 + $0xad0] sm:$0xff] }
  0xb6   : > { %1141 = vmatpush.msra.mxu2 %v554_v44  ;;  %1160 = vmatpush.msra.mxu3 %v571_v45  ;;  %v619_v44 = vld [vmem:[%s1727_s8 + $0xb48] sm:$0xff]  ;;  %v636_v45 = vld [vmem:[%s1727_s8 + $0xbd0] sm:$0xff] }
  0xb7   : > { %1102 = vmatpush.msra.mxu0 %v521_v46  ;;  %1121 = vmatpush.msra.mxu1 %v538_v47  ;;  %v586_v46 = vld [vmem:[%s1727_s8 + $0xa40] sm:$0xff]  ;;  %v603_v47 = vld [vmem:[%s1727_s8 + $0xac8] sm:$0xff] }
  0xb8   : > { %1142 = vmatpush.msra.mxu2 %v553_v48  ;;  %1161 = vmatpush.msra.mxu3 %v570_v49  ;;  %v618_v48 = vld [vmem:[%s1727_s8 + $0xb40] sm:$0xff]  ;;  %v635_v49 = vld [vmem:[%s1727_s8 + $0xbc8] sm:$0xff] }
  0xb9   : > { %1103 = vmatpush.msra.mxu0 %v520_v50  ;;  %1122 = vmatpush.msra.mxu1 %v537_v51  ;;  %v585_v50 = vld [vmem:[%s1727_s8 + $0xa38] sm:$0xff]  ;;  %v602_v51 = vld [vmem:[%s1727_s8 + $0xac0] sm:$0xff] }
  0xba   : > { %1143 = vmatpush.msra.mxu2 %v552_v52  ;;  %1162 = vmatpush.msra.mxu3 %v569_v53  ;;  %v617_v52 = vld [vmem:[%s1727_s8 + $0xb38] sm:$0xff]  ;;  %v634_v53 = vld [vmem:[%s1727_s8 + $0xbc0] sm:$0xff] }
  0xbb   : > { %1104 = vmatpush.msra.mxu0 %v519_v54  ;;  %1123 = vmatpush.msra.mxu1 %v536_v55  ;;  %v584_v54 = vld [vmem:[%s1727_s8 + $0xa30] sm:$0xff]  ;;  %v601_v55 = vld [vmem:[%s1727_s8 + $0xab8] sm:$0xff] }
  0xbc   : > { %1144 = vmatpush.msra.mxu2 %v551_v56  ;;  %1163 = vmatpush.msra.mxu3 %v568_v57  ;;  %v616_v56 = vld [vmem:[%s1727_s8 + $0xb30] sm:$0xff]  ;;  %v633_v57 = vld [vmem:[%s1727_s8 + $0xbb8] sm:$0xff] }
  0xbd   : > { %1105 = vmatpush.msra.mxu0 %v518_v58  ;;  %1124 = vmatpush.msra.mxu1 %v535_v59  ;;  %v583_v58 = vld [vmem:[%s1727_s8 + $0xa28] sm:$0xff]  ;;  %v600_v59 = vld [vmem:[%s1727_s8 + $0xab0] sm:$0xff] }
  0xbe   : > { %1145 = vmatpush.msra.mxu2 %v550_v60  ;;  %1164 = vmatpush.msra.mxu3 %v567_v61  ;;  %v615_v60 = vld [vmem:[%s1727_s8 + $0xb28] sm:$0xff]  ;;  %v632_v61 = vld [vmem:[%s1727_s8 + $0xbb0] sm:$0xff] }
  0xbf   : > { %1106 = vmatpush.msra.mxu0 %v517_v62  ;;  %1125 = vmatpush.msra.mxu1 %v534_v63  ;;  %v582_v62 = vld [vmem:[%s1727_s8 + $0xa20] sm:$0xff]  ;;  %v599_v63 = vld [vmem:[%s1727_s8 + $0xaa8] sm:$0xff] }
  0xc0   : > { %1146 = vmatpush.msra.mxu2 %v549_v0  ;;  %1165 = vmatpush.msra.mxu3 %v566_v1  ;;  %v614_v0 = vld [vmem:[%s1727_s8 + $0xb20] sm:$0xff]  ;;  %v631_v1 = vld [vmem:[%s1727_s8 + $0xba8] sm:$0xff] }
  0xc1   : > { %1107 = vmatpush.msra.mxu0 %v516_v2  ;;  %1126 = vmatpush.msra.mxu1 %v533_v3  ;;  %v581_v2 = vld [vmem:[%s1727_s8 + $0xa18] sm:$0xff]  ;;  %v598_v3 = vld [vmem:[%s1727_s8 + $0xaa0] sm:$0xff] }
  0xc2   : > { %1147 = vmatpush.msra.mxu2 %v548_v4  ;;  %1166 = vmatpush.msra.mxu3 %v565_v5  ;;  %v613_v4 = vld [vmem:[%s1727_s8 + $0xb18] sm:$0xff]  ;;  %v630_v5 = vld [vmem:[%s1727_s8 + $0xba0] sm:$0xff] }
  0xc3   : > { %1108 = vmatpush.msra.mxu0 %v515_v6  ;;  %1127 = vmatpush.msra.mxu1 %v532_v7  ;;  %v580_v6 = vld [vmem:[%s1727_s8 + $0xa10] sm:$0xff]  ;;  %v597_v7 = vld [vmem:[%s1727_s8 + $0xa98] sm:$0xff] }
  0xc4   : > { %1148 = vmatpush.msra.mxu2 %v547_v8  ;;  %1167 = vmatpush.msra.mxu3 %v564_v9  ;;  %v612_v8 = vld [vmem:[%s1727_s8 + $0xb10] sm:$0xff]  ;;  %v629_v9 = vld [vmem:[%s1727_s8 + $0xb98] sm:$0xff] }
  0xc5   : > { %1109 = vmatpush.msra.mxu0 %v514_v10  ;;  %1128 = vmatpush.msra.mxu1 %v531_v11  ;;  %v579_v10 = vld [vmem:[%s1727_s8 + $0xa08] sm:$0xff]  ;;  %v596_v11 = vld [vmem:[%s1727_s8 + $0xa90] sm:$0xff] }
  0xc6   : > { %1149 = vmatpush.msra.mxu2 %v546_v12  ;;  %1168 = vmatpush.msra.mxu3 %v563_v13  ;;  %v611_v12 = vld [vmem:[%s1727_s8 + $0xb08] sm:$0xff]  ;;  %v628_v13 = vld [vmem:[%s1727_s8 + $0xb90] sm:$0xff] }
  0xc7   : > { %1110 = vmatmul.f32.vlgmr.msra.gmra.mxu0 %v242_v14  ;;  %1150 = vmatmul.f32.vlgmr.msra.gmra.mxu2 %v244_v15  ;;  %v578_v14 = vld [vmem:[%s1727_s8 + $0xa00] sm:$0xff]  ;;  %v595_v15 = vld [vmem:[%s1727_s8 + $0xa88] sm:$0xff] }
  0xc8   : > { %1174 = vmatpush.msrb.mxu0 %v593_v16  ;;  %1214 = vmatpush.msrb.mxu2 %v625_v17  ;;  %v610_v16 = vld [vmem:[%s1727_s8 + $0xb00] sm:$0xff]  ;;  %v627_v17 = vld [vmem:[%s1727_s8 + $0xb88] sm:$0xff] }
  0xc9   : > { %1129 = vmatpush.msra.mxu1 %v530_v18  ;;  %1169 = vmatpush.msra.mxu3 %v562_v19  ;;  %v246_v18 = vld [vmem:[%s1861_s13 + $0xa0] sm:$0xff]  ;;  %v248_v19 = vld [vmem:[%s1861_s13 + $0xb0] sm:$0xff] }
  0xca   : > { %1130 = vmatmul.f32.vlgmr.msra.gmra.mxu1 %v243_v20  ;;  %1170 = vmatmul.f32.vlgmr.msra.gmra.mxu3 %v245_v21  ;;  %v657_v20 = vld [vmem:[%s1727_s8 + $0xc78] sm:$0xff] }
  0xcb   : > { %1175 = vmatpush.msrb.mxu0 %v592_v22  ;;  %1194 = vmatpush.msrb.mxu1 %v609_v23  ;;  %v689_v21 = vld [vmem:[%s1727_s8 + $0xd78] sm:$0xff]  ;;  %v594_v22 = vld [vmem:[%s1727_s8 + $0xa80] sm:$0xff] }
  0xcc   : > { %1215 = vmatpush.msrb.mxu2 %v624_v24  ;;  %1234 = vmatpush.msrb.mxu3 %v641_v25  ;;  %v626_v23 = vld [vmem:[%s1727_s8 + $0xb80] sm:$0xff]  ;;  %v247_v24 = vld [vmem:[%s1861_s13 + $0xa8] sm:$0xff]  ;;  %v249_v25 = vld [vmem:[%s1861_s13 + $0xb8] sm:$0xff] }
  0xcd   : > { %1176 = vmatpush.msrb.mxu0 %v591_v26  ;;  %1195 = vmatpush.msrb.mxu1 %v608_v27  ;;  %v656_v26 = vld [vmem:[%s1727_s8 + $0xc70] sm:$0xff]  ;;  %v673_v27 = vld [vmem:[%s1727_s8 + $0xcf8] sm:$0xff] }
  0xce   : > { %1216 = vmatpush.msrb.mxu2 %v623_v28  ;;  %1235 = vmatpush.msrb.mxu3 %v640_v29  ;;  %v688_v28 = vld [vmem:[%s1727_s8 + $0xd70] sm:$0xff]  ;;  %v705_v29 = vld [vmem:[%s1727_s8 + $0xdf8] sm:$0xff] }
  0xcf   : > { %1177 = vmatpush.msrb.mxu0 %v590_v30  ;;  %1196 = vmatpush.msrb.mxu1 %v607_v31  ;;  %v655_v30 = vld [vmem:[%s1727_s8 + $0xc68] sm:$0xff]  ;;  %v672_v31 = vld [vmem:[%s1727_s8 + $0xcf0] sm:$0xff] }
  0xd0   : > { %1217 = vmatpush.msrb.mxu2 %v622_v32  ;;  %1236 = vmatpush.msrb.mxu3 %v639_v33  ;;  %v687_v32 = vld [vmem:[%s1727_s8 + $0xd68] sm:$0xff]  ;;  %v704_v33 = vld [vmem:[%s1727_s8 + $0xdf0] sm:$0xff] }
  0xd1   : > { %1178 = vmatpush.msrb.mxu0 %v589_v34  ;;  %1197 = vmatpush.msrb.mxu1 %v606_v35  ;;  %v654_v34 = vld [vmem:[%s1727_s8 + $0xc60] sm:$0xff]  ;;  %v671_v35 = vld [vmem:[%s1727_s8 + $0xce8] sm:$0xff] }
  0xd2   : > { %1218 = vmatpush.msrb.mxu2 %v621_v36  ;;  %1237 = vmatpush.msrb.mxu3 %v638_v37  ;;  %v686_v36 = vld [vmem:[%s1727_s8 + $0xd60] sm:$0xff]  ;;  %v703_v37 = vld [vmem:[%s1727_s8 + $0xde8] sm:$0xff] }
  0xd3   : > { %1179 = vmatpush.msrb.mxu0 %v588_v38  ;;  %1198 = vmatpush.msrb.mxu1 %v605_v39  ;;  %v653_v38 = vld [vmem:[%s1727_s8 + $0xc58] sm:$0xff]  ;;  %v670_v39 = vld [vmem:[%s1727_s8 + $0xce0] sm:$0xff] }
  0xd4   : > { %1219 = vmatpush.msrb.mxu2 %v620_v40  ;;  %1238 = vmatpush.msrb.mxu3 %v637_v41  ;;  %v685_v40 = vld [vmem:[%s1727_s8 + $0xd58] sm:$0xff]  ;;  %v702_v41 = vld [vmem:[%s1727_s8 + $0xde0] sm:$0xff] }
  0xd5   : > { %1180 = vmatpush.msrb.mxu0 %v587_v42  ;;  %1199 = vmatpush.msrb.mxu1 %v604_v43  ;;  %v652_v42 = vld [vmem:[%s1727_s8 + $0xc50] sm:$0xff]  ;;  %v669_v43 = vld [vmem:[%s1727_s8 + $0xcd8] sm:$0xff] }
  0xd6   : > { %1220 = vmatpush.msrb.mxu2 %v619_v44  ;;  %1239 = vmatpush.msrb.mxu3 %v636_v45  ;;  %v684_v44 = vld [vmem:[%s1727_s8 + $0xd50] sm:$0xff]  ;;  %v701_v45 = vld [vmem:[%s1727_s8 + $0xdd8] sm:$0xff] }
  0xd7   : > { %1181 = vmatpush.msrb.mxu0 %v586_v46  ;;  %1200 = vmatpush.msrb.mxu1 %v603_v47  ;;  %v651_v46 = vld [vmem:[%s1727_s8 + $0xc48] sm:$0xff]  ;;  %v668_v47 = vld [vmem:[%s1727_s8 + $0xcd0] sm:$0xff] }
  0xd8   : > { %1221 = vmatpush.msrb.mxu2 %v618_v48  ;;  %1240 = vmatpush.msrb.mxu3 %v635_v49  ;;  %v683_v48 = vld [vmem:[%s1727_s8 + $0xd48] sm:$0xff]  ;;  %v700_v49 = vld [vmem:[%s1727_s8 + $0xdd0] sm:$0xff] }
  0xd9   : > { %1182 = vmatpush.msrb.mxu0 %v585_v50  ;;  %1201 = vmatpush.msrb.mxu1 %v602_v51  ;;  %v650_v50 = vld [vmem:[%s1727_s8 + $0xc40] sm:$0xff]  ;;  %v667_v51 = vld [vmem:[%s1727_s8 + $0xcc8] sm:$0xff] }
  0xda   : > { %1222 = vmatpush.msrb.mxu2 %v617_v52  ;;  %1241 = vmatpush.msrb.mxu3 %v634_v53  ;;  %v682_v52 = vld [vmem:[%s1727_s8 + $0xd40] sm:$0xff]  ;;  %v699_v53 = vld [vmem:[%s1727_s8 + $0xdc8] sm:$0xff] }
  0xdb   : > { %1183 = vmatpush.msrb.mxu0 %v584_v54  ;;  %1202 = vmatpush.msrb.mxu1 %v601_v55  ;;  %v649_v54 = vld [vmem:[%s1727_s8 + $0xc38] sm:$0xff]  ;;  %v666_v55 = vld [vmem:[%s1727_s8 + $0xcc0] sm:$0xff] }
  0xdc   : > { %1223 = vmatpush.msrb.mxu2 %v616_v56  ;;  %1242 = vmatpush.msrb.mxu3 %v633_v57  ;;  %v681_v56 = vld [vmem:[%s1727_s8 + $0xd38] sm:$0xff]  ;;  %v698_v57 = vld [vmem:[%s1727_s8 + $0xdc0] sm:$0xff] }
  0xdd   : > { %1184 = vmatpush.msrb.mxu0 %v583_v58  ;;  %1203 = vmatpush.msrb.mxu1 %v600_v59  ;;  %v648_v58 = vld [vmem:[%s1727_s8 + $0xc30] sm:$0xff]  ;;  %v665_v59 = vld [vmem:[%s1727_s8 + $0xcb8] sm:$0xff] }
  0xde   : > { %1224 = vmatpush.msrb.mxu2 %v615_v60  ;;  %1243 = vmatpush.msrb.mxu3 %v632_v61  ;;  %v680_v60 = vld [vmem:[%s1727_s8 + $0xd30] sm:$0xff]  ;;  %v697_v61 = vld [vmem:[%s1727_s8 + $0xdb8] sm:$0xff] }
  0xdf   : > { %1185 = vmatpush.msrb.mxu0 %v582_v62  ;;  %1204 = vmatpush.msrb.mxu1 %v599_v63  ;;  %v647_v62 = vld [vmem:[%s1727_s8 + $0xc28] sm:$0xff]  ;;  %v664_v63 = vld [vmem:[%s1727_s8 + $0xcb0] sm:$0xff] }
  0xe0   : > { %1225 = vmatpush.msrb.mxu2 %v614_v0  ;;  %1244 = vmatpush.msrb.mxu3 %v631_v1  ;;  %v679_v0 = vld [vmem:[%s1727_s8 + $0xd28] sm:$0xff]  ;;  %v696_v1 = vld [vmem:[%s1727_s8 + $0xdb0] sm:$0xff] }
  0xe1   : > { %1186 = vmatpush.msrb.mxu0 %v581_v2  ;;  %1205 = vmatpush.msrb.mxu1 %v598_v3  ;;  %v646_v2 = vld [vmem:[%s1727_s8 + $0xc20] sm:$0xff]  ;;  %v663_v3 = vld [vmem:[%s1727_s8 + $0xca8] sm:$0xff] }
  0xe2   : > { %1226 = vmatpush.msrb.mxu2 %v613_v4  ;;  %1245 = vmatpush.msrb.mxu3 %v630_v5  ;;  %v678_v4 = vld [vmem:[%s1727_s8 + $0xd20] sm:$0xff]  ;;  %v695_v5 = vld [vmem:[%s1727_s8 + $0xda8] sm:$0xff] }
  0xe3   : > { %1187 = vmatpush.msrb.mxu0 %v580_v6  ;;  %1206 = vmatpush.msrb.mxu1 %v597_v7  ;;  %v645_v6 = vld [vmem:[%s1727_s8 + $0xc18] sm:$0xff]  ;;  %v662_v7 = vld [vmem:[%s1727_s8 + $0xca0] sm:$0xff] }
  0xe4   : > { %1227 = vmatpush.msrb.mxu2 %v612_v8  ;;  %1246 = vmatpush.msrb.mxu3 %v629_v9  ;;  %v677_v8 = vld [vmem:[%s1727_s8 + $0xd18] sm:$0xff]  ;;  %v694_v9 = vld [vmem:[%s1727_s8 + $0xda0] sm:$0xff] }
  0xe5   : > { %1188 = vmatpush.msrb.mxu0 %v579_v10  ;;  %1207 = vmatpush.msrb.mxu1 %v596_v11  ;;  %v644_v10 = vld [vmem:[%s1727_s8 + $0xc10] sm:$0xff]  ;;  %v661_v11 = vld [vmem:[%s1727_s8 + $0xc98] sm:$0xff] }
  0xe6   : > { %1228 = vmatpush.msrb.mxu2 %v611_v12  ;;  %1247 = vmatpush.msrb.mxu3 %v628_v13  ;;  %v676_v12 = vld [vmem:[%s1727_s8 + $0xd10] sm:$0xff]  ;;  %v693_v13 = vld [vmem:[%s1727_s8 + $0xd98] sm:$0xff] }
  0xe7   : > { %1189 = vmatpush.msrb.mxu0 %v578_v14  ;;  %1208 = vmatpush.msrb.mxu1 %v595_v15  ;;  %v643_v14 = vld [vmem:[%s1727_s8 + $0xc08] sm:$0xff]  ;;  %v660_v15 = vld [vmem:[%s1727_s8 + $0xc90] sm:$0xff] }
  0xe8   : > { %1229 = vmatpush.msrb.mxu2 %v610_v16  ;;  %1248 = vmatpush.msrb.mxu3 %v627_v17  ;;  %v675_v16 = vld [vmem:[%s1727_s8 + $0xd08] sm:$0xff]  ;;  %v692_v17 = vld [vmem:[%s1727_s8 + $0xd90] sm:$0xff] }
  0xe9   : > { %1190 = vmatmul.f32.vlgmr.msrb.gmra.mxu0 %v246_v18  ;;  %1230 = vmatmul.f32.vlgmr.msrb.gmra.mxu2 %v248_v19  ;;  %v642_v18 = vld [vmem:[%s1727_s8 + $0xc00] sm:$0xff]  ;;  %v659_v19 = vld [vmem:[%s1727_s8 + $0xc88] sm:$0xff] }
  0xea   : > { %1254 = vmatpush.msra.mxu0 %v657_v20  ;;  %1294 = vmatpush.msra.mxu2 %v689_v21  ;;  %v674_v20 = vld [vmem:[%s1727_s8 + $0xd00] sm:$0xff]  ;;  %v691_v21 = vld [vmem:[%s1727_s8 + $0xd88] sm:$0xff] }
  0xeb   : > { %1209 = vmatpush.msrb.mxu1 %v594_v22  ;;  %1249 = vmatpush.msrb.mxu3 %v626_v23  ;;  %v250_v22 = vld [vmem:[%s1861_s13 + $0xc0] sm:$0xff]  ;;  %v252_v23 = vld [vmem:[%s1861_s13 + $0xd0] sm:$0xff] }
  0xec   : > { %1210 = vmatmul.f32.vlgmr.msrb.gmra.mxu1 %v247_v24  ;;  %1250 = vmatmul.f32.vlgmr.msrb.gmra.mxu3 %v249_v25  ;;  %v721_v24 = vld [vmem:[%s1727_s8 + $0xe78] sm:$0xff] }
  0xed   : > { %1255 = vmatpush.msra.mxu0 %v656_v26  ;;  %1274 = vmatpush.msra.mxu1 %v673_v27  ;;  %v753_v25 = vld [vmem:[%s1727_s8 + $0xf78] sm:$0xff]  ;;  %v658_v26 = vld [vmem:[%s1727_s8 + $0xc80] sm:$0xff] }
  0xee   : > { %1295 = vmatpush.msra.mxu2 %v688_v28  ;;  %1314 = vmatpush.msra.mxu3 %v705_v29  ;;  %v690_v27 = vld [vmem:[%s1727_s8 + $0xd80] sm:$0xff]  ;;  %v251_v28 = vld [vmem:[%s1861_s13 + $0xc8] sm:$0xff]  ;;  %v253_v29 = vld [vmem:[%s1861_s13 + $0xd8] sm:$0xff] }
  0xef   : > { %1256 = vmatpush.msra.mxu0 %v655_v30  ;;  %1275 = vmatpush.msra.mxu1 %v672_v31  ;;  %v720_v30 = vld [vmem:[%s1727_s8 + $0xe70] sm:$0xff]  ;;  %v737_v31 = vld [vmem:[%s1727_s8 + $0xef8] sm:$0xff] }
  0xf0   : > { %1296 = vmatpush.msra.mxu2 %v687_v32  ;;  %1315 = vmatpush.msra.mxu3 %v704_v33  ;;  %v752_v32 = vld [vmem:[%s1727_s8 + $0xf70] sm:$0xff]  ;;  %v769_v33 = vld [vmem:[%s1727_s8 + $0xff8] sm:$0xff] }
  0xf1   : > { %1257 = vmatpush.msra.mxu0 %v654_v34  ;;  %1276 = vmatpush.msra.mxu1 %v671_v35  ;;  %v719_v34 = vld [vmem:[%s1727_s8 + $0xe68] sm:$0xff]  ;;  %v736_v35 = vld [vmem:[%s1727_s8 + $0xef0] sm:$0xff] }
  0xf2   : > { %1297 = vmatpush.msra.mxu2 %v686_v36  ;;  %1316 = vmatpush.msra.mxu3 %v703_v37  ;;  %v751_v36 = vld [vmem:[%s1727_s8 + $0xf68] sm:$0xff]  ;;  %v768_v37 = vld [vmem:[%s1727_s8 + $0xff0] sm:$0xff] }
  0xf3   : > { %1258 = vmatpush.msra.mxu0 %v653_v38  ;;  %1277 = vmatpush.msra.mxu1 %v670_v39  ;;  %v718_v38 = vld [vmem:[%s1727_s8 + $0xe60] sm:$0xff]  ;;  %v735_v39 = vld [vmem:[%s1727_s8 + $0xee8] sm:$0xff] }
  0xf4   : > { %1298 = vmatpush.msra.mxu2 %v685_v40  ;;  %1317 = vmatpush.msra.mxu3 %v702_v41  ;;  %v750_v40 = vld [vmem:[%s1727_s8 + $0xf60] sm:$0xff]  ;;  %v767_v41 = vld [vmem:[%s1727_s8 + $0xfe8] sm:$0xff] }
  0xf5   : > { %1259 = vmatpush.msra.mxu0 %v652_v42  ;;  %1278 = vmatpush.msra.mxu1 %v669_v43  ;;  %v717_v42 = vld [vmem:[%s1727_s8 + $0xe58] sm:$0xff]  ;;  %v734_v43 = vld [vmem:[%s1727_s8 + $0xee0] sm:$0xff] }
  0xf6   : > { %1299 = vmatpush.msra.mxu2 %v684_v44  ;;  %1318 = vmatpush.msra.mxu3 %v701_v45  ;;  %v749_v44 = vld [vmem:[%s1727_s8 + $0xf58] sm:$0xff]  ;;  %v766_v45 = vld [vmem:[%s1727_s8 + $0xfe0] sm:$0xff] }
  0xf7   : > { %1260 = vmatpush.msra.mxu0 %v651_v46  ;;  %1279 = vmatpush.msra.mxu1 %v668_v47  ;;  %v716_v46 = vld [vmem:[%s1727_s8 + $0xe50] sm:$0xff]  ;;  %v733_v47 = vld [vmem:[%s1727_s8 + $0xed8] sm:$0xff] }
  0xf8   : > { %1300 = vmatpush.msra.mxu2 %v683_v48  ;;  %1319 = vmatpush.msra.mxu3 %v700_v49  ;;  %v748_v48 = vld [vmem:[%s1727_s8 + $0xf50] sm:$0xff]  ;;  %v765_v49 = vld [vmem:[%s1727_s8 + $0xfd8] sm:$0xff] }
  0xf9   : > { %1261 = vmatpush.msra.mxu0 %v650_v50  ;;  %1280 = vmatpush.msra.mxu1 %v667_v51  ;;  %v715_v50 = vld [vmem:[%s1727_s8 + $0xe48] sm:$0xff]  ;;  %v732_v51 = vld [vmem:[%s1727_s8 + $0xed0] sm:$0xff] }
  0xfa   : > { %1301 = vmatpush.msra.mxu2 %v682_v52  ;;  %1320 = vmatpush.msra.mxu3 %v699_v53  ;;  %v747_v52 = vld [vmem:[%s1727_s8 + $0xf48] sm:$0xff]  ;;  %v764_v53 = vld [vmem:[%s1727_s8 + $0xfd0] sm:$0xff] }
  0xfb   : > { %1262 = vmatpush.msra.mxu0 %v649_v54  ;;  %1281 = vmatpush.msra.mxu1 %v666_v55  ;;  %v714_v54 = vld [vmem:[%s1727_s8 + $0xe40] sm:$0xff]  ;;  %v731_v55 = vld [vmem:[%s1727_s8 + $0xec8] sm:$0xff] }
  0xfc   : > { %1302 = vmatpush.msra.mxu2 %v681_v56  ;;  %1321 = vmatpush.msra.mxu3 %v698_v57  ;;  %v746_v56 = vld [vmem:[%s1727_s8 + $0xf40] sm:$0xff]  ;;  %v763_v57 = vld [vmem:[%s1727_s8 + $0xfc8] sm:$0xff] }
  0xfd   : > { %1263 = vmatpush.msra.mxu0 %v648_v58  ;;  %1282 = vmatpush.msra.mxu1 %v665_v59  ;;  %v713_v58 = vld [vmem:[%s1727_s8 + $0xe38] sm:$0xff]  ;;  %v730_v59 = vld [vmem:[%s1727_s8 + $0xec0] sm:$0xff] }
  0xfe   : > { %1303 = vmatpush.msra.mxu2 %v680_v60  ;;  %1322 = vmatpush.msra.mxu3 %v697_v61  ;;  %v745_v60 = vld [vmem:[%s1727_s8 + $0xf38] sm:$0xff]  ;;  %v762_v61 = vld [vmem:[%s1727_s8 + $0xfc0] sm:$0xff] }
  0xff   : > { %1264 = vmatpush.msra.mxu0 %v647_v62  ;;  %1283 = vmatpush.msra.mxu1 %v664_v63  ;;  %v712_v62 = vld [vmem:[%s1727_s8 + $0xe30] sm:$0xff]  ;;  %v729_v63 = vld [vmem:[%s1727_s8 + $0xeb8] sm:$0xff] }
 0x100   : > { %1304 = vmatpush.msra.mxu2 %v679_v0  ;;  %1323 = vmatpush.msra.mxu3 %v696_v1  ;;  %v744_v0 = vld [vmem:[%s1727_s8 + $0xf30] sm:$0xff]  ;;  %v761_v1 = vld [vmem:[%s1727_s8 + $0xfb8] sm:$0xff] }
 0x101   : > { %1265 = vmatpush.msra.mxu0 %v646_v2  ;;  %1284 = vmatpush.msra.mxu1 %v663_v3  ;;  %v711_v2 = vld [vmem:[%s1727_s8 + $0xe28] sm:$0xff]  ;;  %v728_v3 = vld [vmem:[%s1727_s8 + $0xeb0] sm:$0xff] }
 0x102   : > { %1305 = vmatpush.msra.mxu2 %v678_v4  ;;  %1324 = vmatpush.msra.mxu3 %v695_v5  ;;  %v743_v4 = vld [vmem:[%s1727_s8 + $0xf28] sm:$0xff]  ;;  %v760_v5 = vld [vmem:[%s1727_s8 + $0xfb0] sm:$0xff] }
 0x103   : > { %1266 = vmatpush.msra.mxu0 %v645_v6  ;;  %1285 = vmatpush.msra.mxu1 %v662_v7  ;;  %v710_v6 = vld [vmem:[%s1727_s8 + $0xe20] sm:$0xff]  ;;  %v727_v7 = vld [vmem:[%s1727_s8 + $0xea8] sm:$0xff] }
 0x104   : > { %1306 = vmatpush.msra.mxu2 %v677_v8  ;;  %1325 = vmatpush.msra.mxu3 %v694_v9  ;;  %v742_v8 = vld [vmem:[%s1727_s8 + $0xf20] sm:$0xff]  ;;  %v759_v9 = vld [vmem:[%s1727_s8 + $0xfa8] sm:$0xff] }
 0x105   : > { %1267 = vmatpush.msra.mxu0 %v644_v10  ;;  %1286 = vmatpush.msra.mxu1 %v661_v11  ;;  %v709_v10 = vld [vmem:[%s1727_s8 + $0xe18] sm:$0xff]  ;;  %v726_v11 = vld [vmem:[%s1727_s8 + $0xea0] sm:$0xff] }
 0x106   : > { %1307 = vmatpush.msra.mxu2 %v676_v12  ;;  %1326 = vmatpush.msra.mxu3 %v693_v13  ;;  %v741_v12 = vld [vmem:[%s1727_s8 + $0xf18] sm:$0xff]  ;;  %v758_v13 = vld [vmem:[%s1727_s8 + $0xfa0] sm:$0xff] }
 0x107   : > { %1268 = vmatpush.msra.mxu0 %v643_v14  ;;  %1287 = vmatpush.msra.mxu1 %v660_v15  ;;  %v708_v14 = vld [vmem:[%s1727_s8 + $0xe10] sm:$0xff]  ;;  %v725_v15 = vld [vmem:[%s1727_s8 + $0xe98] sm:$0xff] }
 0x108   : > { %1308 = vmatpush.msra.mxu2 %v675_v16  ;;  %1327 = vmatpush.msra.mxu3 %v692_v17  ;;  %v740_v16 = vld [vmem:[%s1727_s8 + $0xf10] sm:$0xff]  ;;  %v757_v17 = vld [vmem:[%s1727_s8 + $0xf98] sm:$0xff] }
 0x109   : > { %1269 = vmatpush.msra.mxu0 %v642_v18  ;;  %1288 = vmatpush.msra.mxu1 %v659_v19  ;;  %v707_v18 = vld [vmem:[%s1727_s8 + $0xe08] sm:$0xff]  ;;  %v724_v19 = vld [vmem:[%s1727_s8 + $0xe90] sm:$0xff] }
 0x10a   : > { %1309 = vmatpush.msra.mxu2 %v674_v20  ;;  %1328 = vmatpush.msra.mxu3 %v691_v21  ;;  %v739_v20 = vld [vmem:[%s1727_s8 + $0xf08] sm:$0xff]  ;;  %v756_v21 = vld [vmem:[%s1727_s8 + $0xf90] sm:$0xff] }
 0x10b   : > { %1270 = vmatmul.f32.vlgmr.msra.gmra.mxu0 %v250_v22  ;;  %1310 = vmatmul.f32.vlgmr.msra.gmra.mxu2 %v252_v23  ;;  %v706_v22 = vld [vmem:[%s1727_s8 + $0xe00] sm:$0xff]  ;;  %v723_v23 = vld [vmem:[%s1727_s8 + $0xe88] sm:$0xff] }
 0x10c   : > { %1334 = vmatpush.msrb.mxu0 %v721_v24  ;;  %1374 = vmatpush.msrb.mxu2 %v753_v25  ;;  %v738_v24 = vld [vmem:[%s1727_s8 + $0xf00] sm:$0xff]  ;;  %v755_v25 = vld [vmem:[%s1727_s8 + $0xf88] sm:$0xff] }
 0x10d   : > { %1289 = vmatpush.msra.mxu1 %v658_v26  ;;  %1329 = vmatpush.msra.mxu3 %v690_v27  ;;  %v254_v26 = vld [vmem:[%s1861_s13 + $0xe0] sm:$0xff]  ;;  %v256_v27 = vld [vmem:[%s1861_s13 + $0xf0] sm:$0xff] }
 0x10e   : > { %1290 = vmatmul.f32.vlgmr.msra.gmra.mxu1 %v251_v28  ;;  %1330 = vmatmul.f32.vlgmr.msra.gmra.mxu3 %v253_v29  ;;  %v722_v28 = vld [vmem:[%s1727_s8 + $0xe80] sm:$0xff] }
 0x10f   : > { %1335 = vmatpush.msrb.mxu0 %v720_v30  ;;  %1354 = vmatpush.msrb.mxu1 %v737_v31  ;;  %v754_v29 = vld [vmem:[%s1727_s8 + $0xf80] sm:$0xff]  ;;  %v255_v30 = vld [vmem:[%s1861_s13 + $0xe8] sm:$0xff]  ;;  %v257_v31 = vld [vmem:[%s1861_s13 + $0xf8] sm:$0xff]  ;;  %s208_s8 = scalar_lea.vmem [#allocation4], %s1516_s26 }
 0x110   : > { %1375 = vmatpush.msrb.mxu2 %v752_v32  ;;  %1394 = vmatpush.msrb.mxu3 %v769_v33  ;;  %v1567_v32 = vld [vmem:[%s224_s17] ss:$0 sm:$0xff]  ;;  %v791_v33 = vpop.f32.mrf.mxu0  ;;  %s1429_s9 = sshll.u32 %s208_s8, 4  ;;  %s1430_s9 = int_to_ptr.vmem [resolvable:$true] %s1429_s9 }
 0x111   : > { %1336 = vmatpush.msrb.mxu0 %v719_v34  ;;  %1355 = vmatpush.msrb.mxu1 %v736_v35  ;;  %v792_v34 = vadd.f32 %v1567_v32, %v791_v33  ;;  %v811_v35 = vpop.f32.mrf.mxu1 }
 0x112   : > { %1376 = vmatpush.msrb.mxu2 %v751_v36  ;;  %1395 = vmatpush.msrb.mxu3 %v768_v37  ;;  %v831_v37 = vpop.f32.mrf.mxu2 }
 0x113   : > { %1337 = vmatpush.msrb.mxu0 %v718_v38  ;;  %1356 = vmatpush.msrb.mxu1 %v735_v39  ;;  %v812_v36 = vadd.f32 %v811_v35, %v792_v34  ;;  %v851_v39 = vpop.f32.mrf.mxu3 }
 0x114   : > { %1377 = vmatpush.msrb.mxu2 %v750_v40  ;;  %1396 = vmatpush.msrb.mxu3 %v767_v41 }
 0x115   : > { %1338 = vmatpush.msrb.mxu0 %v717_v42  ;;  %1357 = vmatpush.msrb.mxu1 %v734_v43  ;;  %v832_v38 = vadd.f32 %v831_v37, %v812_v36 }
 0x116   : > { %1378 = vmatpush.msrb.mxu2 %v749_v44  ;;  %1397 = vmatpush.msrb.mxu3 %v766_v45 }
 0x117   : > { %1339 = vmatpush.msrb.mxu0 %v716_v46  ;;  %1358 = vmatpush.msrb.mxu1 %v733_v47  ;;  %v852_v40 = vadd.f32 %v851_v39, %v832_v38 }
 0x118   : > { %1379 = vmatpush.msrb.mxu2 %v748_v48  ;;  %1398 = vmatpush.msrb.mxu3 %v765_v49  ;;  %v871_v41 = vpop.f32.mrf.mxu0 }
 0x119   : > { %1340 = vmatpush.msrb.mxu0 %v715_v50  ;;  %1359 = vmatpush.msrb.mxu1 %v732_v51  ;;  %v872_v42 = vadd.f32 %v871_v41, %v852_v40  ;;  %v891_v43 = vpop.f32.mrf.mxu1 }
 0x11a   : > { %1380 = vmatpush.msrb.mxu2 %v747_v52  ;;  %1399 = vmatpush.msrb.mxu3 %v764_v53  ;;  %v911_v45 = vpop.f32.mrf.mxu2 }
 0x11b   : > { %1341 = vmatpush.msrb.mxu0 %v714_v54  ;;  %1360 = vmatpush.msrb.mxu1 %v731_v55  ;;  %v892_v44 = vadd.f32 %v891_v43, %v872_v42  ;;  %v931_v47 = vpop.f32.mrf.mxu3 }
 0x11c   : > { %1381 = vmatpush.msrb.mxu2 %v746_v56  ;;  %1400 = vmatpush.msrb.mxu3 %v763_v57 }
 0x11d   : > { %1342 = vmatpush.msrb.mxu0 %v713_v58  ;;  %1361 = vmatpush.msrb.mxu1 %v730_v59  ;;  %v912_v46 = vadd.f32 %v911_v45, %v892_v44 }
 0x11e   : > { %1382 = vmatpush.msrb.mxu2 %v745_v60  ;;  %1401 = vmatpush.msrb.mxu3 %v762_v61 }
 0x11f   : > { %1343 = vmatpush.msrb.mxu0 %v712_v62  ;;  %1362 = vmatpush.msrb.mxu1 %v729_v63  ;;  %v932_v49 = vadd.f32 %v931_v47, %v912_v46 }
 0x120   : > { %1383 = vmatpush.msrb.mxu2 %v744_v0  ;;  %1402 = vmatpush.msrb.mxu3 %v761_v1  ;;  %v951_v48 = vpop.f32.mrf.mxu0 }
 0x121   : > { %1344 = vmatpush.msrb.mxu0 %v711_v2  ;;  %1363 = vmatpush.msrb.mxu1 %v728_v3  ;;  %v952_v50 = vadd.f32 %v951_v48, %v932_v49  ;;  %v971_v51 = vpop.f32.mrf.mxu1 }
 0x122   : > { %1384 = vmatpush.msrb.mxu2 %v743_v4  ;;  %1403 = vmatpush.msrb.mxu3 %v760_v5  ;;  %v991_v52 = vpop.f32.mrf.mxu2 }
 0x123   : > { %1345 = vmatpush.msrb.mxu0 %v710_v6  ;;  %1364 = vmatpush.msrb.mxu1 %v727_v7  ;;  %v972_v53 = vadd.f32 %v971_v51, %v952_v50  ;;  %v1011_v55 = vpop.f32.mrf.mxu3 }
 0x124   : > { %1385 = vmatpush.msrb.mxu2 %v742_v8  ;;  %1404 = vmatpush.msrb.mxu3 %v759_v9 }
 0x125   : > { %1346 = vmatpush.msrb.mxu0 %v709_v10  ;;  %1365 = vmatpush.msrb.mxu1 %v726_v11  ;;  %v992_v54 = vadd.f32 %v991_v52, %v972_v53 }
 0x126   : > { %1386 = vmatpush.msrb.mxu2 %v741_v12  ;;  %1405 = vmatpush.msrb.mxu3 %v758_v13 }
 0x127   : > { %1347 = vmatpush.msrb.mxu0 %v708_v14  ;;  %1366 = vmatpush.msrb.mxu1 %v725_v15  ;;  %v1012_v57 = vadd.f32 %v1011_v55, %v992_v54 }
 0x128   : > { %1387 = vmatpush.msrb.mxu2 %v740_v16  ;;  %1406 = vmatpush.msrb.mxu3 %v757_v17  ;;  %v1031_v56 = vpop.f32.mrf.mxu0 }
 0x129   : > { %1348 = vmatpush.msrb.mxu0 %v707_v18  ;;  %1367 = vmatpush.msrb.mxu1 %v724_v19  ;;  %v1032_v58 = vadd.f32 %v1031_v56, %v1012_v57  ;;  %v1051_v59 = vpop.f32.mrf.mxu1 }
 0x12a   : > { %1388 = vmatpush.msrb.mxu2 %v739_v20  ;;  %1407 = vmatpush.msrb.mxu3 %v756_v21  ;;  %v1071_v60 = vpop.f32.mrf.mxu2 }
 0x12b   : > { %1349 = vmatpush.msrb.mxu0 %v706_v22  ;;  %1368 = vmatpush.msrb.mxu1 %v723_v23  ;;  %v1052_v61 = vadd.f32 %v1051_v59, %v1032_v58  ;;  %v1091_v63 = vpop.f32.mrf.mxu3 }
 0x12c   : > { %1389 = vmatpush.msrb.mxu2 %v738_v24  ;;  %1408 = vmatpush.msrb.mxu3 %v755_v25 }
 0x12d   : > { %1350 = vmatmul.f32.vlgmr.msrb.gmra.mxu0 %v254_v26  ;;  %1390 = vmatmul.f32.vlgmr.msrb.gmra.mxu2 %v256_v27  ;;  %v1072_v62 = vadd.f32 %v1071_v60, %v1052_v61 }
 0x12e   : > { %1369 = vmatpush.msrb.mxu1 %v722_v28  ;;  %1409 = vmatpush.msrb.mxu3 %v754_v29 }
 0x12f   : > { %1370 = vmatmul.f32.vlgmr.msrb.gmra.mxu1 %v255_v30  ;;  %1410 = vmatmul.f32.vlgmr.msrb.gmra.mxu3 %v257_v31  ;;  %v1092_v1 = vadd.f32 %v1091_v63, %v1072_v62 }
 0x144   : > { %v1111_v0 = vpop.f32.mrf.mxu0 }
 0x145   : > { %v1112_v2 = vadd.f32 %v1111_v0, %v1092_v1 }
 0x147   : > { %v1131_v3 = vpop.f32.mrf.mxu1 }
 0x148   : > { %v1132_v5 = vadd.f32 %v1131_v3, %v1112_v2 }
 0x14a   : > { %v1151_v4 = vpop.f32.mrf.mxu2 }
 0x14b   : > { %v1152_v6 = vadd.f32 %v1151_v4, %v1132_v5 }
 0x14d   : > { %v1171_v7 = vpop.f32.mrf.mxu3 }
 0x14e   : > { %v1172_v9 = vadd.f32 %v1171_v7, %v1152_v6 }
 0x166   : > { %v1191_v8 = vpop.f32.mrf.mxu0 }
 0x167   : > { %v1192_v10 = vadd.f32 %v1191_v8, %v1172_v9 }
 0x169   : > { %v1211_v11 = vpop.f32.mrf.mxu1 }
 0x16a   : > { %v1212_v13 = vadd.f32 %v1211_v11, %v1192_v10 }
 0x16c   : > { %v1231_v12 = vpop.f32.mrf.mxu2 }
 0x16d   : > { %v1232_v14 = vadd.f32 %v1231_v12, %v1212_v13 }
 0x16f   : > { %v1251_v15 = vpop.f32.mrf.mxu3 }
 0x170   : > { %v1252_v17 = vadd.f32 %v1251_v15, %v1232_v14 }
 0x188   : > { %v1271_v16 = vpop.f32.mrf.mxu0 }
 0x189   : > { %v1272_v18 = vadd.f32 %v1271_v16, %v1252_v17 }
 0x18b   : > { %v1291_v19 = vpop.f32.mrf.mxu1 }
 0x18c   : > { %v1292_v21 = vadd.f32 %v1291_v19, %v1272_v18 }
 0x18e   : > { %v1311_v20 = vpop.f32.mrf.mxu2 }
 0x18f   : > { %v1312_v22 = vadd.f32 %v1311_v20, %v1292_v21 }
 0x191   : > { %v1331_v23 = vpop.f32.mrf.mxu3 }
 0x192   : > { %v1332_v24 = vadd.f32 %v1331_v23, %v1312_v22 }
 0x1aa   : > { %v1351_v25 = vpop.f32.mrf.mxu0 }
 0x1ab   : > { %v1352_v26 = vadd.f32 %v1351_v25, %v1332_v24 }
 0x1ac   : > { %v1371_v27 = vpop.f32.mrf.mxu1 }
 0x1ad   : > { %v1372_v28 = vadd.f32 %v1371_v27, %v1352_v26 }
 0x1b0   : > { %v1391_v29 = vpop.f32.mrf.mxu2 }
 0x1b1   : > { %v1392_v30 = vadd.f32 %v1391_v29, %v1372_v28 }
 0x1b2   : > { %v1411_v31 = vpop.f32.mrf.mxu3 }
 0x1b3   : > { %v1412_v32 = vadd.f32 %v1411_v31, %v1392_v30 }
 0x1b5   : > { %1415 = vst.msk [vmem:[%s208_s8] sm:$0xff] %vm1414_vm0, %v1412_v32 }
 0x1b6   : > { %1607 = shalt.err (!%p1604_p7)
}
 0x1b7   : > { %1527 = dma.vmem_to_hbm [thread:$0]  (%p1713_p5), %s1430_s9, 128, %s1432_s10, %s1417_s0  }
 0x1b8 PF: > { %p1533_p8 = scmp.ge.s32.totalorder %s1644_s22, 2  ;;  %s1443_s18 = sand.u32 1, %s1632_s19  }
 0x1b9   : > { %s1444_s23 = scalar_lea.sflag [#allocation5], %s1443_s18 }
 0x1ba   : > { %p1530_p9 = pnand %p1533_p8, %p1717_p6 }
 0x1bc   : > { %p1531_p10 = pneg %p1530_p9 }
 0x1be   : > { %1627 = dma.done.wait (%p1531_p10), %s1444_s23, 128  }
 0x1bf   : > { %1629 = vsyncadd (%p1531_p10), %s1444_s23, 4294967168  ;;  %p22_p11 = scmp.ge.s32.totalorder %s1700_s24, 5   ;;  %s2340_s19 = smov %s1636_s20 }
 0x1c0   : > { %s2341_s20 = smov %s1640_s21  ;;  %s2342_s21 = smov %s1711_s27 }
 0x1c1   : > { %s2343_s22 = smov %s1700_s24  ;;  %24 = sbr.rel (!%p22_p11) target bundleno = 9 (0x9), region = 73 }
 0x1c6   :  { %1450 = vsyncpa [#allocation5], 1 }
 0x1c7   :  { %1452 = vsyncpa [#allocation5 + $0x1], 1 }

</bundles_post_ra>
